<compile_context>
chip_gen: v7x
topology: tpu7x:2x2x1
jax: 0.10.0
libtpu: 0.0.40
codegen_flags: <defaults>
</compile_context>

<pallas_src>
import functools

import numpy as np
import jax
import jax.numpy as jnp
from jax.experimental import pallas as pl
from jax.experimental.pallas import tpu as pltpu


def _round_up(v, m):
    return ((v + m - 1) // m) * m


def _tree_lstm_kernel(num_iters, hp,
                      x_ref, a_ref, at_ref, r_ref, w_ref, b_ref,
                      uiou_ref, uf_ref, out_ref, h_sc, c_sc):
    """One grid step == one graph (tree).

    Per-graph blocks:
      x_ref   : (n, dp)    bf16 node features (zero padded)
      a_ref   : (n, n)     bf16 adjacency, a[p, c] = 1 iff c is child of p
      at_ref  : (n, n)     bf16 transpose of a (child -> parent one-hot rows)
      r_ref   : (1, n)     bf16 readout mask (sum readout over real nodes)
      w_ref   : (dp, 4hp)  bf16 fused [W_i | W_o | W_u | W_f]
      b_ref   : (1, 4hp)   f32  fused bias
      uiou_ref: (hp, 3hp)  bf16 fused [U_i | U_o | U_u]
      uf_ref  : (hp, hp)   bf16 U_f
    """
    # ---- hoisted, sweep-invariant work ------------------------------------
    # Input projection for all 4 gates in a single MXU pass (bias folded in).
    xw = jnp.dot(x_ref[...], w_ref[...],
                 preferred_element_type=jnp.float32) + b_ref[...]
    iou_x = xw[:, :3 * hp]                      # (n, 3*hp)  lane-aligned
    f_x = xw[:, 3 * hp:]                        # (n, hp)

    # Per-child gather of the parent's W_f x term via the one-hot A^T matmul.
    # Roots have all-zero A^T rows; their f_edge never contributes because A
    # masks them out in the fc contraction below.
    fx_child = jnp.dot(at_ref[...], f_x.astype(jnp.bfloat16),
                       preferred_element_type=jnp.float32)      # (n, hp)

    a_bf = a_ref[...]                           # (n, n)   bf16 (exact 0/1)
    u_iou = uiou_ref[...]                       # (hp, 3hp) bf16
    u_f = uf_ref[...]                           # (hp, hp)  bf16

    h_sc[...] = jnp.zeros_like(h_sc)
    c_sc[...] = jnp.zeros_like(c_sc)

    # ---- synchronous sweeps (num_iters >= tree depth + 1 => converged) ----
    for _ in range(num_iters):
        h_bf = h_sc[...].astype(jnp.bfloat16)

        # per-child forget gate: f[k] = sigmoid(W_f x_{parent(k)} + U_f h_k)
        f_uh = jnp.dot(h_bf, u_f, preferred_element_type=jnp.float32)
        g = jax.nn.sigmoid(fx_child + f_uh) * c_sc[...]         # (n, hp) f32

        # child-sum of hidden states and forget-gated cell states (MXU)
        h_sum = jnp.dot(a_bf, h_bf, preferred_element_type=jnp.float32)
        fc = jnp.dot(a_bf, g.astype(jnp.bfloat16),
                     preferred_element_type=jnp.float32)

        iou = iou_x + jnp.dot(h_sum.astype(jnp.bfloat16), u_iou,
                              preferred_element_type=jnp.float32)
        i_g = jax.nn.sigmoid(iou[:, :hp])
        o_g = jax.nn.sigmoid(iou[:, hp:2 * hp])
        u_g = jnp.tanh(iou[:, 2 * hp:])

        c_new = i_g * u_g + fc
        c_sc[...] = c_new
        h_sc[...] = o_g * jnp.tanh(c_new)

    # masked sum readout over this graph's nodes -> lane-dense (1, hp)
    out_ref[...] = jnp.dot(r_ref[...], h_sc[...].astype(jnp.bfloat16),
                           preferred_element_type=jnp.float32)


def _pack_params(params, d_in, h, dp, hp):
    """Pad each gate to its own 128-lane block and fuse the input projections."""
    w = jnp.zeros((dp, 4 * hp), jnp.float32)
    b = jnp.zeros((1, 4 * hp), jnp.float32)
    u_iou = jnp.zeros((hp, 3 * hp), jnp.float32)
    u_f = jnp.zeros((hp, hp), jnp.float32)
    for gi in range(3):                                    # i, o, u gates
        w = w.at[:d_in, gi * hp:gi * hp + h].set(
            params["w_iou"][:, gi * h:(gi + 1) * h])
        b = b.at[:, gi * hp:gi * hp + h].set(
            params["b_iou"][:, gi * h:(gi + 1) * h])
        u_iou = u_iou.at[:h, gi * hp:gi * hp + h].set(
            params["u_iou"][:, gi * h:(gi + 1) * h])
    w = w.at[:d_in, 3 * hp:3 * hp + h].set(params["w_f"])          # f gate
    b = b.at[:, 3 * hp:3 * hp + h].set(params["b_f"])
    u_f = u_f.at[:h, :h].set(params["u_f"])
    return (w.astype(jnp.bfloat16), b,
            u_iou.astype(jnp.bfloat16), u_f.astype(jnp.bfloat16))


@functools.partial(jax.jit, static_argnums=(4,))
def tree_lstm_level_encoder(x, adj, node_mask, params, num_iters):
    """Returns (graph_mu, graph_logvar), each of shape (G, H // 2)."""
    g_cnt, n, d_in = x.shape
    h = params["u_f"].shape[0]
    hp = _round_up(h, 128)
    dp = _round_up(d_in, 128)

    x_p = jnp.zeros((g_cnt, n, dp), jnp.float32).at[:, :, :d_in].set(x)
    x_p = x_p.astype(jnp.bfloat16)
    a_p = adj.astype(jnp.bfloat16)                       # 0/1 -> exact in bf16
    at_p = jnp.swapaxes(adj, 1, 2).astype(jnp.bfloat16)  # child -> parent
    r_p = node_mask.reshape(g_cnt, 1, n).astype(jnp.bfloat16)
    w_p, b_p, u_iou_p, u_f_p = _pack_params(params, d_in, h, dp, hp)

    kernel = functools.partial(_tree_lstm_kernel, num_iters, hp)
    graph_encode = pl.pallas_call(
        kernel,
        out_shape=jax.ShapeDtypeStruct((g_cnt, 1, hp), jnp.float32),
        grid=(g_cnt,),
        in_specs=[
            pl.BlockSpec((None, n, dp), lambda g: (g, 0, 0)),   # x
            pl.BlockSpec((None, n, n), lambda g: (g, 0, 0)),    # adjacency
            pl.BlockSpec((None, n, n), lambda g: (g, 0, 0)),    # adjacency^T
            pl.BlockSpec((None, 1, n), lambda g: (g, 0, 0)),    # readout mask
            pl.BlockSpec((dp, 4 * hp), lambda g: (0, 0)),       # fused W
            pl.BlockSpec((1, 4 * hp), lambda g: (0, 0)),        # fused bias
            pl.BlockSpec((hp, 3 * hp), lambda g: (0, 0)),       # U_iou
            pl.BlockSpec((hp, hp), lambda g: (0, 0)),           # U_f
        ],
        out_specs=pl.BlockSpec((None, 1, hp), lambda g: (g, 0, 0)),
        scratch_shapes=[pltpu.VMEM((n, hp), jnp.float32),       # h
                        pltpu.VMEM((n, hp), jnp.float32)],      # c
        compiler_params=pltpu.CompilerParams(
            dimension_semantics=("parallel",)),
    )(x_p, a_p, at_p, r_p, w_p, b_p, u_iou_p, u_f_p)

    graph_encode = graph_encode.reshape(g_cnt, hp)[:, :h]
    half = h // 2
    return graph_encode[:, :half], jnp.tanh(graph_encode[:, half:])


def derive_num_iters(adj_np):
    """Sweeps needed for exactness = longest parent->child path length + 1."""
    step = (np.asarray(adj_np) > 0).astype(np.int32)
    reach = step.copy()
    depth = 0
    while reach.any():
        depth += 1
        reach = (np.einsum("gij,gjk->gik", reach, step) > 0).astype(np.int32)
    return int(depth + 1)


def init_params(key, input_dim, hidden_dim):
    """Deterministic parameter init matching TreeLSTM(input_dim, hidden_dim)."""
    ks = jax.random.split(key, 4)
    scale_in = 1.0 / jnp.sqrt(jnp.float32(input_dim))
    scale_h = 1.0 / jnp.sqrt(jnp.float32(hidden_dim))
    return {
        "w_iou": (jax.random.normal(ks[0], (input_dim, 3 * hidden_dim),
                                    jnp.float32) * scale_in),
        "u_iou": (jax.random.normal(ks[1], (hidden_dim, 3 * hidden_dim),
                                    jnp.float32) * scale_h),
        "b_iou": jnp.zeros((1, 3 * hidden_dim), jnp.float32),
        "w_f": (jax.random.normal(ks[2], (input_dim, hidden_dim),
                                  jnp.float32) * scale_in),
        "u_f": (jax.random.normal(ks[3], (hidden_dim, hidden_dim),
                                  jnp.float32) * scale_h),
        "b_f": jnp.zeros((1, hidden_dim), jnp.float32),
    }


if __name__ == "__main__":
    # Config: latency_input = False
    embedding_size = 32             # -> input_dim = embedding_size * 3 = 96
    graph_embedding_size = 16       # -> TreeLSTM hidden = 2 * 16 = 32
    input_dim = embedding_size * 3
    hidden_dim = graph_embedding_size * 2

    # Two trees ("graphs") of 16 nodes each, binary tree parent(c) = (c-1)//2.
    nodes_per_graph = 16
    num_graphs = 2

    adj_np = np.zeros((num_graphs, nodes_per_graph, nodes_per_graph), np.float32)
    for gi in range(num_graphs):
        for c in range(1, nodes_per_graph):
            adj_np[gi, (c - 1) // 2, c] = 1.0
    adj = jnp.asarray(adj_np)
    node_mask = jnp.ones((num_graphs, nodes_per_graph), jnp.float32)

    key = jax.random.PRNGKey(0)
    k_x, k_p = jax.random.split(key)
    x = jax.random.normal(k_x, (num_graphs, nodes_per_graph, input_dim),
                          jnp.float32)
    params = init_params(k_p, input_dim, hidden_dim)

    num_iters = derive_num_iters(adj_np)   # depth + 1, derived on host (exact)

    mu, logvar = tree_lstm_level_encoder(x, adj, node_mask, params, num_iters)
    mu = jax.block_until_ready(mu)
    logvar = jax.block_until_ready(logvar)

    assert mu.shape == (num_graphs, graph_embedding_size)
    assert logvar.shape == (num_graphs, graph_embedding_size)
    assert bool(jnp.all(jnp.isfinite(mu))) and bool(jnp.all(jnp.isfinite(logvar)))
    print("KERNEL_OK")
</pallas_src>

<mosaic_0001>
module attributes {stable_mosaic.version = 11 : i64} {
  func.func @_tree_lstm_kernel(%arg0: i32, %arg1: memref<1x16x128xbf16, #tpu.memory_space<vmem>>, %arg2: memref<1x16x16xbf16, #tpu.memory_space<vmem>>, %arg3: memref<1x16x16xbf16, #tpu.memory_space<vmem>>, %arg4: memref<1x1x16xbf16, #tpu.memory_space<vmem>>, %arg5: memref<128x512xbf16, #tpu.memory_space<vmem>>, %arg6: memref<1x512xf32, #tpu.memory_space<vmem>>, %arg7: memref<128x384xbf16, #tpu.memory_space<vmem>>, %arg8: memref<128x128xbf16, #tpu.memory_space<vmem>>, %arg9: memref<1x1x128xf32, #tpu.memory_space<vmem>>, %arg10: memref<16x128xf32, #tpu.memory_space<vmem>>, %arg11: memref<16x128xf32, #tpu.memory_space<vmem>>) attributes {dimension_semantics = [#tpu.dimension_semantics<parallel>], iteration_bounds = array<i64: 2>, scalar_prefetch = 0 : i64, scratch_operands = 2 : i64, tpu.core_type = #tpu.core_type<tc>, window_params = [{transform_indices = @transform_0, window_bounds = array<i64: 1, 16, 128>}, {transform_indices = @transform_1, window_bounds = array<i64: 1, 16, 16>}, {transform_indices = @transform_2, window_bounds = array<i64: 1, 16, 16>}, {transform_indices = @transform_3, window_bounds = array<i64: 1, 1, 16>}, {pipeline_mode = #tpu.pipeline_mode<synchronous>, transform_indices = @transform_4, window_bounds = array<i64: 128, 512>}, {pipeline_mode = #tpu.pipeline_mode<synchronous>, transform_indices = @transform_5, window_bounds = array<i64: 1, 512>}, {pipeline_mode = #tpu.pipeline_mode<synchronous>, transform_indices = @transform_6, window_bounds = array<i64: 128, 384>}, {pipeline_mode = #tpu.pipeline_mode<synchronous>, transform_indices = @transform_7, window_bounds = array<i64: 128, 128>}, {transform_indices = @transform_8, window_bounds = array<i64: 1, 1, 128>}]} {
    %c0 = arith.constant 0 : index
    %c0_0 = arith.constant 0 : index
    %c0_1 = arith.constant 0 : index
    %0 = vector.load %arg1[%c0, %c0_0, %c0_1] : memref<1x16x128xbf16, #tpu.memory_space<vmem>>, vector<1x16x128xbf16>
    %1 = vector.shape_cast %0 : vector<1x16x128xbf16> to vector<16x128xbf16>
    %c0_2 = arith.constant 0 : index
    %c0_3 = arith.constant 0 : index
    %2 = vector.load %arg5[%c0_2, %c0_3] : memref<128x512xbf16, #tpu.memory_space<vmem>>, vector<128x512xbf16>
    %cst = arith.constant dense<0.000000e+00> : vector<16x512xf32>
    %3 = tpu.matmul %1, %2, %cst {dimension_numbers = #tpu.dot_dimension_numbers<[1], [0], [0], [1], [0, 0, 1, 1], [], []>} : vector<16x128xbf16>, vector<128x512xbf16>, vector<16x512xf32> -> vector<16x512xf32>
    %c0_4 = arith.constant 0 : index
    %c0_5 = arith.constant 0 : index
    %4 = vector.load %arg6[%c0_4, %c0_5] : memref<1x512xf32, #tpu.memory_space<vmem>>, vector<1x512xf32>
    %5 = vector.broadcast %4 : vector<1x512xf32> to vector<16x512xf32>
    %6 = arith.addf %3, %5 : vector<16x512xf32>
    %7 = vector.extract_strided_slice %6 {offsets = [0, 0], sizes = [16, 384], strides = [1, 1]} : vector<16x512xf32> to vector<16x384xf32>
    %8 = vector.extract_strided_slice %6 {offsets = [0, 384], sizes = [16, 128], strides = [1, 1]} : vector<16x512xf32> to vector<16x128xf32>
    %c0_6 = arith.constant 0 : index
    %c0_7 = arith.constant 0 : index
    %c0_8 = arith.constant 0 : index
    %9 = vector.load %arg3[%c0_6, %c0_7, %c0_8] : memref<1x16x16xbf16, #tpu.memory_space<vmem>>, vector<1x16x16xbf16>
    %10 = vector.shape_cast %9 : vector<1x16x16xbf16> to vector<16x16xbf16>
    %11 = arith.truncf %8 : vector<16x128xf32> to vector<16x128xbf16>
    %cst_9 = arith.constant dense<0.000000e+00> : vector<16x128xf32>
    %12 = tpu.matmul %10, %11, %cst_9 {dimension_numbers = #tpu.dot_dimension_numbers<[1], [0], [0], [1], [0, 0, 1, 1], [], []>} : vector<16x16xbf16>, vector<16x128xbf16>, vector<16x128xf32> -> vector<16x128xf32>
    %c0_10 = arith.constant 0 : index
    %c0_11 = arith.constant 0 : index
    %c0_12 = arith.constant 0 : index
    %13 = vector.load %arg2[%c0_10, %c0_11, %c0_12] : memref<1x16x16xbf16, #tpu.memory_space<vmem>>, vector<1x16x16xbf16>
    %14 = vector.shape_cast %13 : vector<1x16x16xbf16> to vector<16x16xbf16>
    %c0_13 = arith.constant 0 : index
    %c0_14 = arith.constant 0 : index
    %15 = vector.load %arg7[%c0_13, %c0_14] : memref<128x384xbf16, #tpu.memory_space<vmem>>, vector<128x384xbf16>
    %c0_15 = arith.constant 0 : index
    %c0_16 = arith.constant 0 : index
    %16 = vector.load %arg8[%c0_15, %c0_16] : memref<128x128xbf16, #tpu.memory_space<vmem>>, vector<128x128xbf16>
    %cst_17 = arith.constant 0.000000e+00 : f32
    %17 = vector.broadcast %cst_17 : f32 to vector<16x128xf32>
    %c0_18 = arith.constant 0 : index
    %c0_19 = arith.constant 0 : index
    %18 = vector.load %arg10[%c0_18, %c0_19] : memref<16x128xf32, #tpu.memory_space<vmem>>, vector<16x128xf32>
    tpu.vector_store %arg10[%c0_18, %c0_19], %17 {strides = array<i32>} : memref<16x128xf32, #tpu.memory_space<vmem>>, vector<16x128xf32>,
    %cst_20 = arith.constant 0.000000e+00 : f32
    %19 = vector.broadcast %cst_20 : f32 to vector<16x128xf32>
    %c0_21 = arith.constant 0 : index
    %c0_22 = arith.constant 0 : index
    %20 = vector.load %arg11[%c0_21, %c0_22] : memref<16x128xf32, #tpu.memory_space<vmem>>, vector<16x128xf32>
    tpu.vector_store %arg11[%c0_21, %c0_22], %19 {strides = array<i32>} : memref<16x128xf32, #tpu.memory_space<vmem>>, vector<16x128xf32>,
    %c0_23 = arith.constant 0 : index
    %c0_24 = arith.constant 0 : index
    %21 = vector.load %arg10[%c0_23, %c0_24] : memref<16x128xf32, #tpu.memory_space<vmem>>, vector<16x128xf32>
    %22 = arith.truncf %21 : vector<16x128xf32> to vector<16x128xbf16>
    %cst_25 = arith.constant dense<0.000000e+00> : vector<16x128xf32>
    %23 = tpu.matmul %22, %16, %cst_25 {dimension_numbers = #tpu.dot_dimension_numbers<[1], [0], [0], [1], [0, 0, 1, 1], [], []>} : vector<16x128xbf16>, vector<128x128xbf16>, vector<16x128xf32> -> vector<16x128xf32>
    %24 = arith.addf %12, %23 : vector<16x128xf32>
    %25 = arith.negf %24 : vector<16x128xf32>
    %26 = math.exp %25 : vector<16x128xf32>
    %cst_26 = arith.constant 1.000000e+00 : f32
    %27 = vector.broadcast %cst_26 : f32 to vector<16x128xf32>
    %28 = arith.addf %27, %26 : vector<16x128xf32>
    %29 = arith.divf %27, %28 : vector<16x128xf32>
    %c0_27 = arith.constant 0 : index
    %c0_28 = arith.constant 0 : index
    %30 = vector.load %arg11[%c0_27, %c0_28] : memref<16x128xf32, #tpu.memory_space<vmem>>, vector<16x128xf32>
    %31 = arith.mulf %29, %30 : vector<16x128xf32>
    %cst_29 = arith.constant dense<0.000000e+00> : vector<16x128xf32>
    %32 = tpu.matmul %14, %22, %cst_29 {dimension_numbers = #tpu.dot_dimension_numbers<[1], [0], [0], [1], [0, 0, 1, 1], [], []>} : vector<16x16xbf16>, vector<16x128xbf16>, vector<16x128xf32> -> vector<16x128xf32>
    %33 = arith.truncf %31 : vector<16x128xf32> to vector<16x128xbf16>
    %cst_30 = arith.constant dense<0.000000e+00> : vector<16x128xf32>
    %34 = tpu.matmul %14, %33, %cst_30 {dimension_numbers = #tpu.dot_dimension_numbers<[1], [0], [0], [1], [0, 0, 1, 1], [], []>} : vector<16x16xbf16>, vector<16x128xbf16>, vector<16x128xf32> -> vector<16x128xf32>
    %35 = arith.truncf %32 : vector<16x128xf32> to vector<16x128xbf16>
    %cst_31 = arith.constant dense<0.000000e+00> : vector<16x384xf32>
    %36 = tpu.matmul %35, %15, %cst_31 {dimension_numbers = #tpu.dot_dimension_numbers<[1], [0], [0], [1], [0, 0, 1, 1], [], []>} : vector<16x128xbf16>, vector<128x384xbf16>, vector<16x384xf32> -> vector<16x384xf32>
    %37 = arith.addf %7, %36 : vector<16x384xf32>
    %38 = vector.extract_strided_slice %37 {offsets = [0, 0], sizes = [16, 128], strides = [1, 1]} : vector<16x384xf32> to vector<16x128xf32>
    %39 = arith.negf %38 : vector<16x128xf32>
    %40 = math.exp %39 : vector<16x128xf32>
    %cst_32 = arith.constant 1.000000e+00 : f32
    %41 = vector.broadcast %cst_32 : f32 to vector<16x128xf32>
    %42 = arith.addf %41, %40 : vector<16x128xf32>
    %43 = arith.divf %41, %42 : vector<16x128xf32>
    %44 = vector.extract_strided_slice %37 {offsets = [0, 128], sizes = [16, 128], strides = [1, 1]} : vector<16x384xf32> to vector<16x128xf32>
    %45 = arith.negf %44 : vector<16x128xf32>
    %46 = math.exp %45 : vector<16x128xf32>
    %cst_33 = arith.constant 1.000000e+00 : f32
    %47 = vector.broadcast %cst_33 : f32 to vector<16x128xf32>
    %48 = arith.addf %47, %46 : vector<16x128xf32>
    %49 = arith.divf %47, %48 : vector<16x128xf32>
    %50 = vector.extract_strided_slice %37 {offsets = [0, 256], sizes = [16, 128], strides = [1, 1]} : vector<16x384xf32> to vector<16x128xf32>
    %51 = math.tanh %50 : vector<16x128xf32>
    %52 = arith.mulf %43, %51 : vector<16x128xf32>
    %53 = arith.addf %52, %34 : vector<16x128xf32>
    %c0_34 = arith.constant 0 : index
    %c0_35 = arith.constant 0 : index
    %54 = vector.load %arg11[%c0_34, %c0_35] : memref<16x128xf32, #tpu.memory_space<vmem>>, vector<16x128xf32>
    tpu.vector_store %arg11[%c0_34, %c0_35], %53 {strides = array<i32>} : memref<16x128xf32, #tpu.memory_space<vmem>>, vector<16x128xf32>,
    %55 = math.tanh %53 : vector<16x128xf32>
    %56 = arith.mulf %49, %55 : vector<16x128xf32>
    %c0_36 = arith.constant 0 : index
    %c0_37 = arith.constant 0 : index
    %57 = vector.load %arg10[%c0_36, %c0_37] : memref<16x128xf32, #tpu.memory_space<vmem>>, vector<16x128xf32>
    tpu.vector_store %arg10[%c0_36, %c0_37], %56 {strides = array<i32>} : memref<16x128xf32, #tpu.memory_space<vmem>>, vector<16x128xf32>,
    %c0_38 = arith.constant 0 : index
    %c0_39 = arith.constant 0 : index
    %58 = vector.load %arg10[%c0_38, %c0_39] : memref<16x128xf32, #tpu.memory_space<vmem>>, vector<16x128xf32>
    %59 = arith.truncf %58 : vector<16x128xf32> to vector<16x128xbf16>
    %cst_40 = arith.constant dense<0.000000e+00> : vector<16x128xf32>
    %60 = tpu.matmul %59, %16, %cst_40 {dimension_numbers = #tpu.dot_dimension_numbers<[1], [0], [0], [1], [0, 0, 1, 1], [], []>} : vector<16x128xbf16>, vector<128x128xbf16>, vector<16x128xf32> -> vector<16x128xf32>
    %61 = arith.addf %12, %60 : vector<16x128xf32>
    %62 = arith.negf %61 : vector<16x128xf32>
    %63 = math.exp %62 : vector<16x128xf32>
    %cst_41 = arith.constant 1.000000e+00 : f32
    %64 = vector.broadcast %cst_41 : f32 to vector<16x128xf32>
    %65 = arith.addf %64, %63 : vector<16x128xf32>
    %66 = arith.divf %64, %65 : vector<16x128xf32>
    %c0_42 = arith.constant 0 : index
    %c0_43 = arith.constant 0 : index
    %67 = vector.load %arg11[%c0_42, %c0_43] : memref<16x128xf32, #tpu.memory_space<vmem>>, vector<16x128xf32>
    %68 = arith.mulf %66, %67 : vector<16x128xf32>
    %cst_44 = arith.constant dense<0.000000e+00> : vector<16x128xf32>
    %69 = tpu.matmul %14, %59, %cst_44 {dimension_numbers = #tpu.dot_dimension_numbers<[1], [0], [0], [1], [0, 0, 1, 1], [], []>} : vector<16x16xbf16>, vector<16x128xbf16>, vector<16x128xf32> -> vector<16x128xf32>
    %70 = arith.truncf %68 : vector<16x128xf32> to vector<16x128xbf16>
    %cst_45 = arith.constant dense<0.000000e+00> : vector<16x128xf32>
    %71 = tpu.matmul %14, %70, %cst_45 {dimension_numbers = #tpu.dot_dimension_numbers<[1], [0], [0], [1], [0, 0, 1, 1], [], []>} : vector<16x16xbf16>, vector<16x128xbf16>, vector<16x128xf32> -> vector<16x128xf32>
    %72 = arith.truncf %69 : vector<16x128xf32> to vector<16x128xbf16>
    %cst_46 = arith.constant dense<0.000000e+00> : vector<16x384xf32>
    %73 = tpu.matmul %72, %15, %cst_46 {dimension_numbers = #tpu.dot_dimension_numbers<[1], [0], [0], [1], [0, 0, 1, 1], [], []>} : vector<16x128xbf16>, vector<128x384xbf16>, vector<16x384xf32> -> vector<16x384xf32>
    %74 = arith.addf %7, %73 : vector<16x384xf32>
    %75 = vector.extract_strided_slice %74 {offsets = [0, 0], sizes = [16, 128], strides = [1, 1]} : vector<16x384xf32> to vector<16x128xf32>
    %76 = arith.negf %75 : vector<16x128xf32>
    %77 = math.exp %76 : vector<16x128xf32>
    %cst_47 = arith.constant 1.000000e+00 : f32
    %78 = vector.broadcast %cst_47 : f32 to vector<16x128xf32>
    %79 = arith.addf %78, %77 : vector<16x128xf32>
    %80 = arith.divf %78, %79 : vector<16x128xf32>
    %81 = vector.extract_strided_slice %74 {offsets = [0, 128], sizes = [16, 128], strides = [1, 1]} : vector<16x384xf32> to vector<16x128xf32>
    %82 = arith.negf %81 : vector<16x128xf32>
    %83 = math.exp %82 : vector<16x128xf32>
    %cst_48 = arith.constant 1.000000e+00 : f32
    %84 = vector.broadcast %cst_48 : f32 to vector<16x128xf32>
    %85 = arith.addf %84, %83 : vector<16x128xf32>
    %86 = arith.divf %84, %85 : vector<16x128xf32>
    %87 = vector.extract_strided_slice %74 {offsets = [0, 256], sizes = [16, 128], strides = [1, 1]} : vector<16x384xf32> to vector<16x128xf32>
    %88 = math.tanh %87 : vector<16x128xf32>
    %89 = arith.mulf %80, %88 : vector<16x128xf32>
    %90 = arith.addf %89, %71 : vector<16x128xf32>
    %c0_49 = arith.constant 0 : index
    %c0_50 = arith.constant 0 : index
    %91 = vector.load %arg11[%c0_49, %c0_50] : memref<16x128xf32, #tpu.memory_space<vmem>>, vector<16x128xf32>
    tpu.vector_store %arg11[%c0_49, %c0_50], %90 {strides = array<i32>} : memref<16x128xf32, #tpu.memory_space<vmem>>, vector<16x128xf32>,
    %92 = math.tanh %90 : vector<16x128xf32>
    %93 = arith.mulf %86, %92 : vector<16x128xf32>
    %c0_51 = arith.constant 0 : index
    %c0_52 = arith.constant 0 : index
    %94 = vector.load %arg10[%c0_51, %c0_52] : memref<16x128xf32, #tpu.memory_space<vmem>>, vector<16x128xf32>
    tpu.vector_store %arg10[%c0_51, %c0_52], %93 {strides = array<i32>} : memref<16x128xf32, #tpu.memory_space<vmem>>, vector<16x128xf32>,
    %c0_53 = arith.constant 0 : index
    %c0_54 = arith.constant 0 : index
    %95 = vector.load %arg10[%c0_53, %c0_54] : memref<16x128xf32, #tpu.memory_space<vmem>>, vector<16x128xf32>
    %96 = arith.truncf %95 : vector<16x128xf32> to vector<16x128xbf16>
    %cst_55 = arith.constant dense<0.000000e+00> : vector<16x128xf32>
    %97 = tpu.matmul %96, %16, %cst_55 {dimension_numbers = #tpu.dot_dimension_numbers<[1], [0], [0], [1], [0, 0, 1, 1], [], []>} : vector<16x128xbf16>, vector<128x128xbf16>, vector<16x128xf32> -> vector<16x128xf32>
    %98 = arith.addf %12, %97 : vector<16x128xf32>
    %99 = arith.negf %98 : vector<16x128xf32>
    %100 = math.exp %99 : vector<16x128xf32>
    %cst_56 = arith.constant 1.000000e+00 : f32
    %101 = vector.broadcast %cst_56 : f32 to vector<16x128xf32>
    %102 = arith.addf %101, %100 : vector<16x128xf32>
    %103 = arith.divf %101, %102 : vector<16x128xf32>
    %c0_57 = arith.constant 0 : index
    %c0_58 = arith.constant 0 : index
    %104 = vector.load %arg11[%c0_57, %c0_58] : memref<16x128xf32, #tpu.memory_space<vmem>>, vector<16x128xf32>
    %105 = arith.mulf %103, %104 : vector<16x128xf32>
    %cst_59 = arith.constant dense<0.000000e+00> : vector<16x128xf32>
    %106 = tpu.matmul %14, %96, %cst_59 {dimension_numbers = #tpu.dot_dimension_numbers<[1], [0], [0], [1], [0, 0, 1, 1], [], []>} : vector<16x16xbf16>, vector<16x128xbf16>, vector<16x128xf32> -> vector<16x128xf32>
    %107 = arith.truncf %105 : vector<16x128xf32> to vector<16x128xbf16>
    %cst_60 = arith.constant dense<0.000000e+00> : vector<16x128xf32>
    %108 = tpu.matmul %14, %107, %cst_60 {dimension_numbers = #tpu.dot_dimension_numbers<[1], [0], [0], [1], [0, 0, 1, 1], [], []>} : vector<16x16xbf16>, vector<16x128xbf16>, vector<16x128xf32> -> vector<16x128xf32>
    %109 = arith.truncf %106 : vector<16x128xf32> to vector<16x128xbf16>
    %cst_61 = arith.constant dense<0.000000e+00> : vector<16x384xf32>
    %110 = tpu.matmul %109, %15, %cst_61 {dimension_numbers = #tpu.dot_dimension_numbers<[1], [0], [0], [1], [0, 0, 1, 1], [], []>} : vector<16x128xbf16>, vector<128x384xbf16>, vector<16x384xf32> -> vector<16x384xf32>
    %111 = arith.addf %7, %110 : vector<16x384xf32>
    %112 = vector.extract_strided_slice %111 {offsets = [0, 0], sizes = [16, 128], strides = [1, 1]} : vector<16x384xf32> to vector<16x128xf32>
    %113 = arith.negf %112 : vector<16x128xf32>
    %114 = math.exp %113 : vector<16x128xf32>
    %cst_62 = arith.constant 1.000000e+00 : f32
    %115 = vector.broadcast %cst_62 : f32 to vector<16x128xf32>
    %116 = arith.addf %115, %114 : vector<16x128xf32>
    %117 = arith.divf %115, %116 : vector<16x128xf32>
    %118 = vector.extract_strided_slice %111 {offsets = [0, 128], sizes = [16, 128], strides = [1, 1]} : vector<16x384xf32> to vector<16x128xf32>
    %119 = arith.negf %118 : vector<16x128xf32>
    %120 = math.exp %119 : vector<16x128xf32>
    %cst_63 = arith.constant 1.000000e+00 : f32
    %121 = vector.broadcast %cst_63 : f32 to vector<16x128xf32>
    %122 = arith.addf %121, %120 : vector<16x128xf32>
    %123 = arith.divf %121, %122 : vector<16x128xf32>
    %124 = vector.extract_strided_slice %111 {offsets = [0, 256], sizes = [16, 128], strides = [1, 1]} : vector<16x384xf32> to vector<16x128xf32>
    %125 = math.tanh %124 : vector<16x128xf32>
    %126 = arith.mulf %117, %125 : vector<16x128xf32>
    %127 = arith.addf %126, %108 : vector<16x128xf32>
    %c0_64 = arith.constant 0 : index
    %c0_65 = arith.constant 0 : index
    %128 = vector.load %arg11[%c0_64, %c0_65] : memref<16x128xf32, #tpu.memory_space<vmem>>, vector<16x128xf32>
    tpu.vector_store %arg11[%c0_64, %c0_65], %127 {strides = array<i32>} : memref<16x128xf32, #tpu.memory_space<vmem>>, vector<16x128xf32>,
    %129 = math.tanh %127 : vector<16x128xf32>
    %130 = arith.mulf %123, %129 : vector<16x128xf32>
    %c0_66 = arith.constant 0 : index
    %c0_67 = arith.constant 0 : index
    %131 = vector.load %arg10[%c0_66, %c0_67] : memref<16x128xf32, #tpu.memory_space<vmem>>, vector<16x128xf32>
    tpu.vector_store %arg10[%c0_66, %c0_67], %130 {strides = array<i32>} : memref<16x128xf32, #tpu.memory_space<vmem>>, vector<16x128xf32>,
    %c0_68 = arith.constant 0 : index
    %c0_69 = arith.constant 0 : index
    %132 = vector.load %arg10[%c0_68, %c0_69] : memref<16x128xf32, #tpu.memory_space<vmem>>, vector<16x128xf32>
    %133 = arith.truncf %132 : vector<16x128xf32> to vector<16x128xbf16>
    %cst_70 = arith.constant dense<0.000000e+00> : vector<16x128xf32>
    %134 = tpu.matmul %133, %16, %cst_70 {dimension_numbers = #tpu.dot_dimension_numbers<[1], [0], [0], [1], [0, 0, 1, 1], [], []>} : vector<16x128xbf16>, vector<128x128xbf16>, vector<16x128xf32> -> vector<16x128xf32>
    %135 = arith.addf %12, %134 : vector<16x128xf32>
    %136 = arith.negf %135 : vector<16x128xf32>
    %137 = math.exp %136 : vector<16x128xf32>
    %cst_71 = arith.constant 1.000000e+00 : f32
    %138 = vector.broadcast %cst_71 : f32 to vector<16x128xf32>
    %139 = arith.addf %138, %137 : vector<16x128xf32>
    %140 = arith.divf %138, %139 : vector<16x128xf32>
    %c0_72 = arith.constant 0 : index
    %c0_73 = arith.constant 0 : index
    %141 = vector.load %arg11[%c0_72, %c0_73] : memref<16x128xf32, #tpu.memory_space<vmem>>, vector<16x128xf32>
    %142 = arith.mulf %140, %141 : vector<16x128xf32>
    %cst_74 = arith.constant dense<0.000000e+00> : vector<16x128xf32>
    %143 = tpu.matmul %14, %133, %cst_74 {dimension_numbers = #tpu.dot_dimension_numbers<[1], [0], [0], [1], [0, 0, 1, 1], [], []>} : vector<16x16xbf16>, vector<16x128xbf16>, vector<16x128xf32> -> vector<16x128xf32>
    %144 = arith.truncf %142 : vector<16x128xf32> to vector<16x128xbf16>
    %cst_75 = arith.constant dense<0.000000e+00> : vector<16x128xf32>
    %145 = tpu.matmul %14, %144, %cst_75 {dimension_numbers = #tpu.dot_dimension_numbers<[1], [0], [0], [1], [0, 0, 1, 1], [], []>} : vector<16x16xbf16>, vector<16x128xbf16>, vector<16x128xf32> -> vector<16x128xf32>
    %146 = arith.truncf %143 : vector<16x128xf32> to vector<16x128xbf16>
    %cst_76 = arith.constant dense<0.000000e+00> : vector<16x384xf32>
    %147 = tpu.matmul %146, %15, %cst_76 {dimension_numbers = #tpu.dot_dimension_numbers<[1], [0], [0], [1], [0, 0, 1, 1], [], []>} : vector<16x128xbf16>, vector<128x384xbf16>, vector<16x384xf32> -> vector<16x384xf32>
    %148 = arith.addf %7, %147 : vector<16x384xf32>
    %149 = vector.extract_strided_slice %148 {offsets = [0, 0], sizes = [16, 128], strides = [1, 1]} : vector<16x384xf32> to vector<16x128xf32>
    %150 = arith.negf %149 : vector<16x128xf32>
    %151 = math.exp %150 : vector<16x128xf32>
    %cst_77 = arith.constant 1.000000e+00 : f32
    %152 = vector.broadcast %cst_77 : f32 to vector<16x128xf32>
    %153 = arith.addf %152, %151 : vector<16x128xf32>
    %154 = arith.divf %152, %153 : vector<16x128xf32>
    %155 = vector.extract_strided_slice %148 {offsets = [0, 128], sizes = [16, 128], strides = [1, 1]} : vector<16x384xf32> to vector<16x128xf32>
    %156 = arith.negf %155 : vector<16x128xf32>
    %157 = math.exp %156 : vector<16x128xf32>
    %cst_78 = arith.constant 1.000000e+00 : f32
    %158 = vector.broadcast %cst_78 : f32 to vector<16x128xf32>
    %159 = arith.addf %158, %157 : vector<16x128xf32>
    %160 = arith.divf %158, %159 : vector<16x128xf32>
    %161 = vector.extract_strided_slice %148 {offsets = [0, 256], sizes = [16, 128], strides = [1, 1]} : vector<16x384xf32> to vector<16x128xf32>
    %162 = math.tanh %161 : vector<16x128xf32>
    %163 = arith.mulf %154, %162 : vector<16x128xf32>
    %164 = arith.addf %163, %145 : vector<16x128xf32>
    %c0_79 = arith.constant 0 : index
    %c0_80 = arith.constant 0 : index
    %165 = vector.load %arg11[%c0_79, %c0_80] : memref<16x128xf32, #tpu.memory_space<vmem>>, vector<16x128xf32>
    tpu.vector_store %arg11[%c0_79, %c0_80], %164 {strides = array<i32>} : memref<16x128xf32, #tpu.memory_space<vmem>>, vector<16x128xf32>,
    %166 = math.tanh %164 : vector<16x128xf32>
    %167 = arith.mulf %160, %166 : vector<16x128xf32>
    %c0_81 = arith.constant 0 : index
    %c0_82 = arith.constant 0 : index
    %168 = vector.load %arg10[%c0_81, %c0_82] : memref<16x128xf32, #tpu.memory_space<vmem>>, vector<16x128xf32>
    tpu.vector_store %arg10[%c0_81, %c0_82], %167 {strides = array<i32>} : memref<16x128xf32, #tpu.memory_space<vmem>>, vector<16x128xf32>,
    %c0_83 = arith.constant 0 : index
    %c0_84 = arith.constant 0 : index
    %169 = vector.load %arg10[%c0_83, %c0_84] : memref<16x128xf32, #tpu.memory_space<vmem>>, vector<16x128xf32>
    %170 = arith.truncf %169 : vector<16x128xf32> to vector<16x128xbf16>
    %cst_85 = arith.constant dense<0.000000e+00> : vector<16x128xf32>
    %171 = tpu.matmul %170, %16, %cst_85 {dimension_numbers = #tpu.dot_dimension_numbers<[1], [0], [0], [1], [0, 0, 1, 1], [], []>} : vector<16x128xbf16>, vector<128x128xbf16>, vector<16x128xf32> -> vector<16x128xf32>
    %172 = arith.addf %12, %171 : vector<16x128xf32>
    %173 = arith.negf %172 : vector<16x128xf32>
    %174 = math.exp %173 : vector<16x128xf32>
    %cst_86 = arith.constant 1.000000e+00 : f32
    %175 = vector.broadcast %cst_86 : f32 to vector<16x128xf32>
    %176 = arith.addf %175, %174 : vector<16x128xf32>
    %177 = arith.divf %175, %176 : vector<16x128xf32>
    %c0_87 = arith.constant 0 : index
    %c0_88 = arith.constant 0 : index
    %178 = vector.load %arg11[%c0_87, %c0_88] : memref<16x128xf32, #tpu.memory_space<vmem>>, vector<16x128xf32>
    %179 = arith.mulf %177, %178 : vector<16x128xf32>
    %cst_89 = arith.constant dense<0.000000e+00> : vector<16x128xf32>
    %180 = tpu.matmul %14, %170, %cst_89 {dimension_numbers = #tpu.dot_dimension_numbers<[1], [0], [0], [1], [0, 0, 1, 1], [], []>} : vector<16x16xbf16>, vector<16x128xbf16>, vector<16x128xf32> -> vector<16x128xf32>
    %181 = arith.truncf %179 : vector<16x128xf32> to vector<16x128xbf16>
    %cst_90 = arith.constant dense<0.000000e+00> : vector<16x128xf32>
    %182 = tpu.matmul %14, %181, %cst_90 {dimension_numbers = #tpu.dot_dimension_numbers<[1], [0], [0], [1], [0, 0, 1, 1], [], []>} : vector<16x16xbf16>, vector<16x128xbf16>, vector<16x128xf32> -> vector<16x128xf32>
    %183 = arith.truncf %180 : vector<16x128xf32> to vector<16x128xbf16>
    %cst_91 = arith.constant dense<0.000000e+00> : vector<16x384xf32>
    %184 = tpu.matmul %183, %15, %cst_91 {dimension_numbers = #tpu.dot_dimension_numbers<[1], [0], [0], [1], [0, 0, 1, 1], [], []>} : vector<16x128xbf16>, vector<128x384xbf16>, vector<16x384xf32> -> vector<16x384xf32>
    %185 = arith.addf %7, %184 : vector<16x384xf32>
    %186 = vector.extract_strided_slice %185 {offsets = [0, 0], sizes = [16, 128], strides = [1, 1]} : vector<16x384xf32> to vector<16x128xf32>
    %187 = arith.negf %186 : vector<16x128xf32>
    %188 = math.exp %187 : vector<16x128xf32>
    %cst_92 = arith.constant 1.000000e+00 : f32
    %189 = vector.broadcast %cst_92 : f32 to vector<16x128xf32>
    %190 = arith.addf %189, %188 : vector<16x128xf32>
    %191 = arith.divf %189, %190 : vector<16x128xf32>
    %192 = vector.extract_strided_slice %185 {offsets = [0, 128], sizes = [16, 128], strides = [1, 1]} : vector<16x384xf32> to vector<16x128xf32>
    %193 = arith.negf %192 : vector<16x128xf32>
    %194 = math.exp %193 : vector<16x128xf32>
    %cst_93 = arith.constant 1.000000e+00 : f32
    %195 = vector.broadcast %cst_93 : f32 to vector<16x128xf32>
    %196 = arith.addf %195, %194 : vector<16x128xf32>
    %197 = arith.divf %195, %196 : vector<16x128xf32>
    %198 = vector.extract_strided_slice %185 {offsets = [0, 256], sizes = [16, 128], strides = [1, 1]} : vector<16x384xf32> to vector<16x128xf32>
    %199 = math.tanh %198 : vector<16x128xf32>
    %200 = arith.mulf %191, %199 : vector<16x128xf32>
    %201 = arith.addf %200, %182 : vector<16x128xf32>
    %c0_94 = arith.constant 0 : index
    %c0_95 = arith.constant 0 : index
    %202 = vector.load %arg11[%c0_94, %c0_95] : memref<16x128xf32, #tpu.memory_space<vmem>>, vector<16x128xf32>
    tpu.vector_store %arg11[%c0_94, %c0_95], %201 {strides = array<i32>} : memref<16x128xf32, #tpu.memory_space<vmem>>, vector<16x128xf32>,
    %203 = math.tanh %201 : vector<16x128xf32>
    %204 = arith.mulf %197, %203 : vector<16x128xf32>
    %c0_96 = arith.constant 0 : index
    %c0_97 = arith.constant 0 : index
    %205 = vector.load %arg10[%c0_96, %c0_97] : memref<16x128xf32, #tpu.memory_space<vmem>>, vector<16x128xf32>
    tpu.vector_store %arg10[%c0_96, %c0_97], %204 {strides = array<i32>} : memref<16x128xf32, #tpu.memory_space<vmem>>, vector<16x128xf32>,
    %c0_98 = arith.constant 0 : index
    %c0_99 = arith.constant 0 : index
    %c0_100 = arith.constant 0 : index
    %206 = vector.load %arg4[%c0_98, %c0_99, %c0_100] : memref<1x1x16xbf16, #tpu.memory_space<vmem>>, vector<1x1x16xbf16>
    %207 = vector.shape_cast %206 : vector<1x1x16xbf16> to vector<1x16xbf16>
    %c0_101 = arith.constant 0 : index
    %c0_102 = arith.constant 0 : index
    %208 = vector.load %arg10[%c0_101, %c0_102] : memref<16x128xf32, #tpu.memory_space<vmem>>, vector<16x128xf32>
    %209 = arith.truncf %208 : vector<16x128xf32> to vector<16x128xbf16>
    %cst_103 = arith.constant dense<0.000000e+00> : vector<1x128xf32>
    %210 = tpu.matmul %207, %209, %cst_103 {dimension_numbers = #tpu.dot_dimension_numbers<[1], [0], [0], [1], [0, 0, 1, 1], [], []>} : vector<1x16xbf16>, vector<16x128xbf16>, vector<1x128xf32> -> vector<1x128xf32>
    %c0_104 = arith.constant 0 : index
    %c0_105 = arith.constant 0 : index
    %c0_106 = arith.constant 0 : index
    %211 = vector.load %arg9[%c0_104, %c0_105, %c0_106] : memref<1x1x128xf32, #tpu.memory_space<vmem>>, vector<1x1x128xf32>
    %212 = vector.shape_cast %211 : vector<1x1x128xf32> to vector<1x128xf32>
    %213 = vector.shape_cast %210 : vector<1x128xf32> to vector<1x1x128xf32>
    tpu.vector_store %arg9[%c0_104, %c0_105, %c0_106], %213 {strides = array<i32>} : memref<1x1x128xf32, #tpu.memory_space<vmem>>, vector<1x1x128xf32>,
    return
  }
  func.func @transform_0(%arg0: i32) -> (i32, i32, i32) {
    %c0_i32 = arith.constant 0 : i32
    %c0_i32_0 = arith.constant 0 : i32
    %c0_i32_1 = arith.constant 0 : i32
    return %arg0, %c0_i32, %c0_i32_0 : i32, i32, i32
  }
  func.func @transform_1(%arg0: i32) -> (i32, i32, i32) {
    %c0_i32 = arith.constant 0 : i32
    %c0_i32_0 = arith.constant 0 : i32
    %c0_i32_1 = arith.constant 0 : i32
    return %arg0, %c0_i32, %c0_i32_0 : i32, i32, i32
  }
  func.func @transform_2(%arg0: i32) -> (i32, i32, i32) {
    %c0_i32 = arith.constant 0 : i32
    %c0_i32_0 = arith.constant 0 : i32
    %c0_i32_1 = arith.constant 0 : i32
    return %arg0, %c0_i32, %c0_i32_0 : i32, i32, i32
  }
  func.func @transform_3(%arg0: i32) -> (i32, i32, i32) {
    %c0_i32 = arith.constant 0 : i32
    %c0_i32_0 = arith.constant 0 : i32
    %c0_i32_1 = arith.constant 0 : i32
    return %arg0, %c0_i32, %c0_i32_0 : i32, i32, i32
  }
  func.func @transform_4(%arg0: i32) -> (i32, i32) {
    %c0_i32 = arith.constant 0 : i32
    %c0_i32_0 = arith.constant 0 : i32
    %c0_i32_1 = arith.constant 0 : i32
    return %c0_i32, %c0_i32_0 : i32, i32
  }
  func.func @transform_5(%arg0: i32) -> (i32, i32) {
    %c0_i32 = arith.constant 0 : i32
    %c0_i32_0 = arith.constant 0 : i32
    %c0_i32_1 = arith.constant 0 : i32
    return %c0_i32, %c0_i32_0 : i32, i32
  }
  func.func @transform_6(%arg0: i32) -> (i32, i32) {
    %c0_i32 = arith.constant 0 : i32
    %c0_i32_0 = arith.constant 0 : i32
    %c0_i32_1 = arith.constant 0 : i32
    return %c0_i32, %c0_i32_0 : i32, i32
  }
  func.func @transform_7(%arg0: i32) -> (i32, i32) {
    %c0_i32 = arith.constant 0 : i32
    %c0_i32_0 = arith.constant 0 : i32
    %c0_i32_1 = arith.constant 0 : i32
    return %c0_i32, %c0_i32_0 : i32, i32
  }
  func.func @transform_8(%arg0: i32) -> (i32, i32, i32) {
    %c0_i32 = arith.constant 0 : i32
    %c0_i32_0 = arith.constant 0 : i32
    %c0_i32_1 = arith.constant 0 : i32
    return %arg0, %c0_i32, %c0_i32_0 : i32, i32, i32
  }
}

</mosaic_0001>

<bundles_post_ra>
// kernel: tree_lstm_level_encoder.1
= control target key start
LH: loop header
LB: loop body
LE: loop exit
PB: predicated region body
PF: predicated region fallthrough
CT: control target
= control target key end

     0   :  { %s3318_s27 = smov 0   ;;  %s4114_s0 = inlined_call_operand.vmem [shape: bf16[2,16,128], index: 0, kind: input, shape index: {}]   ;;  %s4115_s1 = inlined_call_operand.vmem [shape: bf16[2,16,16], index: 1, kind: input, shape index: {}]   ;;  %s4116_s2 = inlined_call_operand.vmem [shape: bf16[2,16,16], index: 2, kind: input, shape index: {}]   ;;  %s4117_s3 = inlined_call_operand.vmem [shape: bf16[2,1,16], index: 3, kind: input, shape index: {}]   ;;  %s4118_s4 = inlined_call_operand.vmem [shape: bf16[128,512], index: 4, kind: input, shape index: {}]   ;;  %s4119_s5 = inlined_call_operand.vmem [shape: f32[1,512], index: 5, kind: input, shape index: {}]   ;;  %s4120_s6 = inlined_call_operand.vmem [shape: bf16[128,384], index: 6, kind: input, shape index: {}]   ;;  %s4121_s7 = inlined_call_operand.vmem [shape: bf16[128,128], index: 7, kind: input, shape index: {}]   ;;  %s4122_s8 = inlined_call_operand.vmem [shape: f32[2,1,128], index: 8, kind: output, shape index: {}]  }
   0x1 LB: > { %s2454_s28 = sadd.s32 4294967295, %s3267_s27   ;;  %p2458_p0 = scmp.ge.s32.totalorder %s3267_s27, 1  ;;  %s3267_s27 = sphi %s3318_s27, %s18_s27  }
   0x2   : > { %p290_p1 = scmp.lt.s32.totalorder %s3267_s27, 3 }
   0x4   : > { %p291_p2 = pnand %p2458_p0, %p290_p1 }
   0x5   : > { %v2977_v0 = vld [vmem:[%s4118_s4 + $0xc] ss:$16 sps:$4 sm:$0xff] (!%p291_p2)   ;;  %p335_p3 = scmp.lt.s32.totalorder (!%p291_p2), %s2454_s28, 1  ;;  %v2979_v1 = vld [vmem:[%s4118_s4 + $0x8] ss:$16 sps:$4 sm:$0xff] (!%p291_p2)   ;;  %v3269_v2 = vmov (!%p291_p2), 0   ;;  %v393_v49 = vlaneseq (!%p291_p2) }
   0x6   : > { %294 = sbr.rel (%p291_p2) target bundleno = 3189 (0xc75), region = 52  ;;  %654 = vmatprep.mubr.bf16.mxu1 (!%p291_p2), %v3269_v2  ;;  %611 = vmatprep.mubr.bf16.mxu0 (!%p291_p2), %v3269_v2  ;;  %v2980_v3 = vld [vmem:[%s4118_s4 + $0x2c] ss:$16 sps:$4 sm:$0xff] (!%p291_p2)   ;;  %v2982_v4 = vld [vmem:[%s4118_s4 + $0x28] ss:$16 sps:$4 sm:$0xff] (!%p291_p2)   ;;  %v3430_v27 = vld [vmem:[%s4121_s7] sm:$0xff] (!%p291_p2)  }
   0x7   : > { %622 = vmatprep.subr.bf16.mxu1 (!%p291_p2), %v2977_v0  ;;  %v2983_v5 = vld [vmem:[%s4118_s4 + $0x4c] ss:$16 sps:$4 sm:$0xff] (!%p291_p2)   ;;  %v2985_v6 = vld [vmem:[%s4118_s4 + $0x48] ss:$16 sps:$4 sm:$0xff] (!%p291_p2)   ;;  %v3003_v10 = vld [vmem:[%s4118_s4 + $0x4] ss:$16 sps:$4 sm:$0xff] (!%p291_p2)  }
   0x8   : > { %623 = vmatpush1.bf16.msra.mxu1 (!%p291_p2), %v2979_v1  ;;  %v2986_v7 = vld [vmem:[%s4118_s4 + $0x6c] ss:$16 sps:$4 sm:$0xff] (!%p291_p2)   ;;  %v2988_v8 = vld [vmem:[%s4118_s4 + $0x68] ss:$16 sps:$4 sm:$0xff] (!%p291_p2)   ;;  %v3005_v11 = vld [vmem:[%s4118_s4] ss:$16 sps:$4 sm:$0xff] (!%p291_p2)   ;;  %579 = vmatprep.subr.bf16.mxu0 (!%p291_p2), %v3003_v10 }
   0x9   : > { %624 = vmatprep.subr.bf16.mxu1 (!%p291_p2), %v2980_v3  ;;  %v2989_v9 = vld [vmem:[%s4118_s4 + $0x8c] ss:$16 sps:$4 sm:$0xff] (!%p291_p2)   ;;  %v2991_v12 = vld [vmem:[%s4118_s4 + $0x88] ss:$16 sps:$4 sm:$0xff] (!%p291_p2)   ;;  %v3006_v13 = vld [vmem:[%s4118_s4 + $0x24] ss:$16 sps:$4 sm:$0xff] (!%p291_p2)   ;;  %580 = vmatpush1.bf16.msra.mxu0 (!%p291_p2), %v3005_v11 }
   0xa   : > { %v2992_v14 = vld [vmem:[%s4118_s4 + $0xac] ss:$16 sps:$4 sm:$0xff] (!%p291_p2)   ;;  %v3008_v15 = vld [vmem:[%s4118_s4 + $0x20] ss:$16 sps:$4 sm:$0xff] (!%p291_p2)   ;;  %581 = vmatprep.subr.bf16.mxu0 (!%p291_p2), %v3006_v13  ;;  %v3009_v16 = vld [vmem:[%s4118_s4 + $0x44] ss:$16 sps:$4 sm:$0xff] (!%p291_p2)  }
   0xb   : > { %v2994_v17 = vld [vmem:[%s4118_s4 + $0xa8] ss:$16 sps:$4 sm:$0xff] (!%p291_p2)   ;;  %v2995_v18 = vld [vmem:[%s4118_s4 + $0xcc] ss:$16 sps:$4 sm:$0xff] (!%p291_p2)   ;;  %v3011_v19 = vld [vmem:[%s4118_s4 + $0x40] ss:$16 sps:$4 sm:$0xff] (!%p291_p2)  }
   0xc   : > { %625 = vmatpush1.bf16.msra.mxu1 (!%p291_p2), %v2982_v4  ;;  %v3013_v20 = vld [vmem:[%s4118_s4 + $0x64] ss:$16 sps:$4 sm:$0xff] (!%p291_p2)   ;;  %v2997_v21 = vld [vmem:[%s4118_s4 + $0xc8] ss:$16 sps:$4 sm:$0xff] (!%p291_p2)   ;;  %v2998_v22 = vld [vmem:[%s4118_s4 + $0xec] ss:$16 sps:$4 sm:$0xff] (!%p291_p2)  }
   0xd   : > { %s4124_s28 = smov (!%p335_p3, %s2454_s28), 1  ;;  %626 = vmatprep.subr.bf16.mxu1 %v2983_v5  ;;  %582 = vmatpush1.bf16.msra.mxu0 %v3008_v15  ;;  %v3015_v23 = vld [vmem:[%s4118_s4 + $0x60] ss:$16 sps:$4 sm:$0xff]   ;;  %v3017_v24 = vld [vmem:[%s4118_s4 + $0x84] ss:$16 sps:$4 sm:$0xff]   ;;  %v3270_v31 = vmov 0.0  }
   0xe   : > { %s3346_s17 = sshll.u32 %s4124_s28, 3  ;;  %583 = vmatprep.subr.bf16.mxu0 %v3009_v16  ;;  %v3000_v25 = vld [vmem:[%s4118_s4 + $0xe8] ss:$16 sps:$4 sm:$0xff]   ;;  %v3019_v28 = vld [vmem:[%s4118_s4 + $0x80] ss:$16 sps:$4 sm:$0xff]   ;;  %vm3271_vm0 = vmmov 0   ;;  %s352_s12 = scalar_lea.vmem %s4117_s3, %s4124_s28 }
   0xf   : > { %s339_s24 = scalar_lea.vmem %s4114_s0, %s3346_s17  ;;  %s349_s9 = scalar_lea.vmem %s4116_s2, %s3346_s17  ;;  %v3021_v29 = vld [vmem:[%s4118_s4 + $0xa4] ss:$16 sps:$4 sm:$0xff]   ;;  %v3023_v30 = vld [vmem:[%s4118_s4 + $0xa0] ss:$16 sps:$4 sm:$0xff]   ;;  %v3448_v33 = vld [vmem:[%s4121_s7 + $0x8] sm:$0xff]   ;;  %v3272_v43 = vmov 0.0|0.0  }
  0x10   : > { %627 = vmatpush1.bf16.msra.mxu1 %v2985_v6  ;;  %s3372_s14 = scalar_lea.vmem %s4115_s1, %s3346_s17  ;;  %v3001_v26 = vld [vmem:[%s339_s24] sm:$0xff]   ;;  %v3461_v36 = vld [vmem:[%s4121_s7 + $0x10] sm:$0xff]   ;;  %v3472_v38 = vld [vmem:[%s4121_s7 + $0x18] sm:$0xff]   ;;  %v3547_v50 = vshrl.u32 %v393_v49, 7  ;;  %vm673_vm1 = vcmask 130048   ;;  %s355_s16 = scalar_lea.vmem %s4122_s8, %s4124_s28 }
  0x11   : > { %628 = vmatprep.subr.bf16.mxu1 %v2986_v7  ;;  %584 = vmatpush1.bf16.msra.mxu0 %v3011_v19  ;;  %v3025_v32 = vld [vmem:[%s4118_s4 + $0xc4] ss:$16 sps:$4 sm:$0xff]   ;;  %v3027_v34 = vld [vmem:[%s4118_s4 + $0xc0] ss:$16 sps:$4 sm:$0xff]   ;;  %v3487_v40 = vld [vmem:[%s4121_s7 + $0x28] sm:$0xff]  }
  0x12   : > { %585 = vmatprep.subr.bf16.mxu0 %v3013_v20  ;;  %v3029_v35 = vld [vmem:[%s4118_s4 + $0xe4] ss:$16 sps:$4 sm:$0xff]   ;;  %v3031_v37 = vld [vmem:[%s4118_s4 + $0xe0] ss:$16 sps:$4 sm:$0xff]   ;;  %v3502_v42 = vld [vmem:[%s4121_s7 + $0x38] sm:$0xff]   ;;  %v407_v51 = vsub.s32 3, %v3547_v50 }
  0x13   : > { %v3480_v39 = vld [vmem:[%s4121_s7 + $0x20] sm:$0xff]   ;;  %v3495_v41 = vld [vmem:[%s4121_s7 + $0x30] sm:$0xff]   ;;  %v3628_v49 = vld [vmem:[%s4120_s6 + $0x1c] ss:$12 sps:$4 sm:$0xff]  }
  0x14   : > { %629 = vmatpush1.bf16.msra.mxu1 %v2988_v8  ;;  %v3515_v44 = vld [vmem:[%s4120_s6 + $0x8] ss:$12 sps:$4 sm:$0xff]   ;;  %v3521_v45 = vld [vmem:[%s4120_s6 + $0x20] ss:$12 sps:$4 sm:$0xff]   ;;  %v3528_v46 = vld [vmem:[%s4120_s6 + $0x38] ss:$12 sps:$4 sm:$0xff]  }
  0x15   : > { %630 = vmatprep.subr.bf16.mxu1 %v2989_v9  ;;  %586 = vmatpush1.bf16.msra.mxu0 %v3015_v23  ;;  %v3535_v47 = vld [vmem:[%s4120_s6 + $0x50] ss:$12 sps:$4 sm:$0xff]   ;;  %v3543_v48 = vld [vmem:[%s4120_s6 + $0x68] ss:$12 sps:$4 sm:$0xff]   ;;  %v3553_v52 = vld [vmem:[%s4119_s5] sm:$0xf] }
  0x16   : > { %587 = vmatprep.subr.bf16.mxu0 %v3017_v24  ;;  %v408_v54 = vrot.slane %v3553_v52, %v407_v51  ;;  %v3035_v61 = vld [vmem:[%s349_s9] sm:$0xff]   ;;  %v3602_v10 = vld [vmem:[%s4120_s6 + $0xb0] ss:$12 sps:$4 sm:$0xff]  }
  0x17   : > { %v3573_v63 = vld [vmem:[%s3372_s14] sm:$0xff]  }
  0x18   : > { %631 = vmatpush1.bf16.msra.mxu1 %v2991_v12  ;;  %v3588_v8 = vld [vmem:[%s4120_s6 + $0x80] ss:$12 sps:$4 sm:$0xff]   ;;  %v3595_v9 = vld [vmem:[%s4120_s6 + $0x98] ss:$12 sps:$4 sm:$0xff]  }
  0x19   : > { %632 = vmatprep.subr.bf16.mxu1 %v2992_v14  ;;  %588 = vmatpush1.bf16.msra.mxu0 %v3019_v28  ;;  %v3636_v51 = vld [vmem:[%s4120_s6 + $0x18] ss:$12 sps:$4 sm:$0xff]  }
  0x1a   : > { %589 = vmatprep.subr.bf16.mxu0 %v3021_v29 }
  0x1c   : > { %633 = vmatpush1.bf16.msra.mxu1 %v2994_v17 }
  0x1d   : > { %634 = vmatprep.subr.bf16.mxu1 %v2995_v18  ;;  %590 = vmatpush1.bf16.msra.mxu0 %v3023_v30 }
  0x1e   : > { %591 = vmatprep.subr.bf16.mxu0 %v3025_v32 }
  0x20   : > { %635 = vmatpush1.bf16.msra.mxu1 %v2997_v21 }
  0x21   : > { %636 = vmatprep.subr.bf16.mxu1 %v2998_v22  ;;  %592 = vmatpush1.bf16.msra.mxu0 %v3027_v34 }
  0x22   : > { %593 = vmatprep.subr.bf16.mxu0 %v3029_v35  ;;  %v3617_v35 = vld [vmem:[%s4120_s6 + $0x4] ss:$12 sps:$4 sm:$0xff]  }
  0x24   : > { %637 = vmatpush1.bf16.msra.mxu1 %v3000_v25 }
  0x25   : > { %2699 = vmatprep.subr.bf16.mxu1 %v3270_v31  ;;  %594 = vmatpush1.bf16.msra.mxu0 %v3031_v37 }
  0x26   : > { %2693 = vmatprep.subr.bf16.mxu0 %v3270_v31 }
  0x27   : > { %655 = vmatmul.mubr.bf16.vlgmr.msra.gmra.mrb[0].mxu1 %v3001_v26 }
  0x28   : > { %2700 = vmatpush3.bf16.msra.mxu1 %v3430_v27  ;;  %612 = vmatmul.mubr.bf16.vlgmr.msra.gmra.mrb[0].mxu0 %v3001_v26 }
  0x29   : > { %2701 = vmatprep.subr.bf16.mxu1 %v3270_v31  ;;  %2715 = vmatprep.mubr.msk.bf16.mxu1 %vm3271_vm0, %v3270_v31 }
  0x2a   : > { %2695 = vmatprep.mubr.msk.bf16.mxu0 %vm3271_vm0, %v3270_v31 }
  0x2c   : > { %2702 = vmatpush3.bf16.msra.mxu1 %v3448_v33 }
  0x2d   : > { %2703 = vmatprep.subr.bf16.mxu1 %v3270_v31 }
  0x30   : > { %2704 = vmatpush3.bf16.msra.mxu1 %v3461_v36 }
  0x31   : > { %2705 = vmatprep.subr.bf16.mxu1 %v3270_v31 }
  0x34   : > { %2706 = vmatpush3.bf16.msra.mxu1 %v3472_v38 }
  0x35   : > { %2707 = vmatprep.subr.bf16.mxu1 %v3270_v31 }
  0x38   : > { %2708 = vmatpush3.bf16.msra.mxu1 %v3480_v39 }
  0x39   : > { %2709 = vmatprep.subr.bf16.mxu1 %v3270_v31 }
  0x3c   : > { %2710 = vmatpush3.bf16.msra.mxu1 %v3487_v40 }
  0x3d   : > { %2711 = vmatprep.subr.bf16.mxu1 %v3270_v31 }
  0x40   : > { %2712 = vmatpush3.bf16.msra.mxu1 %v3495_v41 }
  0x41   : > { %2713 = vmatprep.subr.bf16.mxu1 %v3270_v31 }
  0x44   : > { %2714 = vmatpush3.bf16.msra.mxu1 %v3502_v42 }
  0x45   : > { %2731 = vmatprep.subr.bf16.mxu1 %v3270_v31 }
  0x47   : > { %2716 = vmatmul.mubr.bf16.vlgmr.msra.gmra.mrb[4].mxu1 %v3272_v43 }
  0x48   : > { %2747 = vmatprep.mubr.msk.bf16.mxu1 %vm3271_vm0, %v3270_v31  ;;  %2732 = vmatpush3.bf16.msra.mxu1 %v3515_v44 }
  0x49   : > { %2733 = vmatprep.subr.bf16.mxu1 %v3270_v31 }
  0x4c   : > { %2734 = vmatpush3.bf16.msra.mxu1 %v3521_v45 }
  0x4d   : > { %2735 = vmatprep.subr.bf16.mxu1 %v3270_v31 }
  0x50   : > { %2736 = vmatpush3.bf16.msra.mxu1 %v3528_v46 }
  0x51   : > { %2737 = vmatprep.subr.bf16.mxu1 %v3270_v31 }
  0x54   : > { %2738 = vmatpush3.bf16.msra.mxu1 %v3535_v47 }
  0x55   : > { %2739 = vmatprep.subr.bf16.mxu1 %v3270_v31 }
  0x58   : > { %2740 = vmatpush3.bf16.msra.mxu1 %v3543_v48 }
  0x59   : > { %2741 = vmatprep.subr.bf16.mxu1 %v3270_v31 }
  0x5c   : > { %2742 = vmatpush3.bf16.msra.mxu1 %v3588_v8 }
  0x5d   : > { %2743 = vmatprep.subr.bf16.mxu1 %v3270_v31 }
  0x60   : > { %2744 = vmatpush3.bf16.msra.mxu1 %v3595_v9 }
  0x61   : > { %2745 = vmatprep.subr.bf16.mxu1 %v3270_v31 }
  0x64   : > { %2746 = vmatpush3.bf16.msra.mxu1 %v3602_v10 }
  0x65   : > { %2771 = vmatprep.subr.bf16.mxu1 %v3270_v31 }
  0xfa   : > { %v3555_v53 = vpop.f32.mrb[0].mxu1 }
  0xfb   : > { %v658_v55 = vpop.f32.mrb[1].mxu1  ;;  %v3570_v62 = vpop.f32.mrb[0].mxu0 }
  0xfc   : > { %v3558_v56 = vpop.f32.mrb[2].mxu1  ;;  %v659_v58 = vadd.f32 %v658_v55, %v408_v54  ;;  %v3575_v0 = vpop.f32.mrb[1].mxu0  ;;  %v3649_v55 = vld [vmem:[%s4120_s6 + $0x30] ss:$12 sps:$4 sm:$0xff]  }
  0xfd   : > { %v662_v57 = vpop.f32.mrb[3].mxu1  ;;  %v3577_v1 = vpop.f32.mrb[2].mxu0 }
  0xfe   : > { %v663_v59 = vadd.f32 %v662_v57, %v408_v54  ;;  %v3579_v3 = vpop.f32.mrb[3].mxu0  ;;  %v3643_v54 = vld [vmem:[%s4120_s6 + $0x34] ss:$12 sps:$4 sm:$0xff]   ;;  %v3655_v57 = vld [vmem:[%s4120_s6 + $0x4c] ss:$12 sps:$4 sm:$0xff]  }
 0x100   : > { %v667_v60 = vpack.c.bf16 %v663_v59, %v659_v58  ;;  %v3661_v58 = vld [vmem:[%s4120_s6 + $0x48] ss:$12 sps:$4 sm:$0xff]   ;;  %v3667_v59 = vld [vmem:[%s4120_s6 + $0x64] ss:$12 sps:$4 sm:$0xff]  }
 0x102   : > { %2694 = vmatpush3.bf16.msra.mxu0 %v667_v60  ;;  %v3673_v60 = vld [vmem:[%s4120_s6 + $0x60] ss:$12 sps:$4 sm:$0xff]  }
 0x103   : > { %2719 = vmatprep.subr.bf16.mxu0 %v3270_v31 }
 0x105   : > { %2696 = vmatmul.mubr.msk.bf16.vlgmr.msra.gmra.mrb[4].mxu0 %vm673_vm1, %v3035_v61  ;;  %v3679_v61 = vld [vmem:[%s4120_s6 + $0x7c] ss:$12 sps:$4 sm:$0xff]  }
 0x106   : > { %2720 = vmatpush3.bf16.msra.mxu0 %v3272_v43  ;;  %2721 = vmatprep.mubr.msk.bf16.mxu0 %vm3271_vm0, %v3270_v31  ;;  %v3622_v43 = vld [vmem:[%s4120_s6] ss:$12 sps:$4 sm:$0xff]  }
 0x107   : > { %2725 = vmatprep.subr.bf16.mxu0 %v3270_v31 }
 0x10d   : > { %2722 = vmatmul.mubr.msk.bf16.vlgmr.msra.gmra.mrb[8].mxu0 %vm673_vm1, %v3573_v63 }
 0x10e   : > { %2727 = vmatprep.mubr.msk.bf16.mxu0 %vm3271_vm0, %v3270_v31 }
 0x11a   : > { %v857_v4 = vpop.f32.mrb[4].mxu1 }
 0x11b   : > { %v2717_v5 = vpop.f32.mrb[5].mxu1 }
 0x11c   : > { %v860_v6 = vpop.f32.mrb[6].mxu1  ;;  %v3691_v5 = vld [vmem:[%s4120_s6 + $0x94] ss:$12 sps:$4 sm:$0xff]  }
 0x11d   : > { %v2718_v7 = vpop.f32.mrb[7].mxu1 }
 0x11e   : > { %v3703_v7 = vld [vmem:[%s4120_s6 + $0xac] ss:$12 sps:$4 sm:$0xff]  }
 0x1d8   : > { %v3606_v11 = vpop.f32.mrb[4].mxu0 }
 0x1d9   : > { %v864_v12 = vadd.f32 %v857_v4, %v3606_v11  ;;  %v2697_v13 = vpop.f32.mrb[5].mxu0  ;;  %v3685_v4 = vld [vmem:[%s4120_s6 + $0x78] ss:$12 sps:$4 sm:$0xff]  }
 0x1da   : > { %v3609_v14 = vpop.f32.mrb[6].mxu0 }
 0x1db   : > { %v2508_v15 = vmul.f32 -1.442695, %v864_v12  ;;  %v865_v16 = vadd.f32 %v860_v6, %v3609_v14  ;;  %v2698_v17 = vpop.f32.mrb[7].mxu0  ;;  %v3697_v6 = vld [vmem:[%s4120_s6 + $0x90] ss:$12 sps:$4 sm:$0xff]  }
 0x1dc   : > { %v3709_v12 = vld [vmem:[%s4120_s6 + $0xa8] ss:$12 sps:$4 sm:$0xff]  }
 0x1dd   : > { %3068 = vpow2.f32 %v2508_v15  ;;  %v2509_v18 = vmul.f32 -1.442695, %v865_v16 }
 0x1df   : > { %3070 = vpow2.f32 %v2509_v18 }
 0x1e0   : > { %v924_v19 = vpop.f32.mrb[8].mxu0 }
 0x1e1   : > { %v2723_v20 = vpop.f32.mrb[9].mxu0 }
 0x1e2   : > { %v927_v21 = vpop.f32.mrb[10].mxu0 }
 0x1e3   : > { %v973_v22 = vpack.c.bf16 %v927_v21, %v924_v19  ;;  %v2724_v23 = vpop.f32.mrb[11].mxu0 }
 0x1e5   : > { %2748 = vmatmul.mubr.bf16.vlgmr.msra.gmra.mrb[8].mxu1 %v973_v22 }
 0x1e6   : > { %2773 = vmatprep.mubr.msk.bf16.mxu1 %vm3271_vm0, %v3270_v31 }
 0x1e7   : > { %v3069_v24 = vpop.eup %3068 }
 0x1e8   : > { %v872_v25 = vadd.f32 1.0, %v3069_v24  ;;  %v399_v24 = vsub.s32 1, %v3547_v50 }
 0x1e9   : > { %v3071_v26 = vpop.eup %3070 }
 0x1ea   : > { %v873_v28 = vadd.f32 1.0, %v3071_v26  ;;  %3072 = vrcp.f32 %v872_v25 }
 0x1ec   : > { %3074 = vrcp.f32 %v873_v28  ;;  %v400_v28 = vrot.slane %v3553_v52, %v399_v24 }
 0x1f4   : > { %v3073_v29 = vpop.eup %3072 }
 0x1f5   : > { %v880_v32 = vmul.f32 0.0, %v3073_v29 }
 0x1f6   : > { %v3075_v30 = vpop.eup %3074 }
 0x1f7   : > { %v881_v34 = vmul.f32 0.0, %v3075_v30 }
 0x1f9   : > { %v931_v37 = vpack.c.bf16 %v881_v34, %v880_v32  ;;  %v403_v34 = vsub.s32 2, %v3547_v50 }
 0x1fb   : > { %2726 = vmatpush3.bf16.msra.mxu0 %v931_v37 }
 0x1fc   : > { %1102 = vmatprep.subr.bf16.mxu0 %v3617_v35 }
 0x1fe   : > { %2728 = vmatmul.mubr.msk.bf16.vlgmr.msra.gmra.mrb[12].mxu0 %vm673_vm1, %v3573_v63 }
 0x1ff   : > { %1103 = vmatpush1.bf16.msra.mxu0 %v3622_v43  ;;  %1134 = vmatprep.mubr.bf16.mxu0 %v3269_v2 }
 0x200   : > { %1104 = vmatprep.subr.bf16.mxu0 %v3628_v49 }
 0x203   : > { %1105 = vmatpush1.bf16.msra.mxu0 %v3636_v51 }
 0x204   : > { %1106 = vmatprep.subr.bf16.mxu0 %v3643_v54 }
 0x207   : > { %1107 = vmatpush1.bf16.msra.mxu0 %v3649_v55 }
 0x208   : > { %1108 = vmatprep.subr.bf16.mxu0 %v3655_v57 }
 0x20b   : > { %1109 = vmatpush1.bf16.msra.mxu0 %v3661_v58 }
 0x20c   : > { %1110 = vmatprep.subr.bf16.mxu0 %v3667_v59 }
 0x20f   : > { %1111 = vmatpush1.bf16.msra.mxu0 %v3673_v60 }
 0x210   : > { %1112 = vmatprep.subr.bf16.mxu0 %v3679_v61 }
 0x213   : > { %1113 = vmatpush1.bf16.msra.mxu0 %v3685_v4 }
 0x214   : > { %1114 = vmatprep.subr.bf16.mxu0 %v3691_v5 }
 0x217   : > { %1115 = vmatpush1.bf16.msra.mxu0 %v3697_v6 }
 0x218   : > { %1116 = vmatprep.subr.bf16.mxu0 %v3703_v7 }
 0x21b   : > { %1117 = vmatpush1.bf16.msra.mxu0 %v3709_v12 }
 0x21c   : > { %2751 = vmatprep.subr.bf16.mxu0 %v3270_v31 }
 0x21e   : > { %1135 = vmatmul.mubr.bf16.vlgmr.msra.gmra.mrb[16].mxu0 %v973_v22  ;;  %v395_v22 = vsub.s32 0, %v3547_v50 }
 0x21f   : > { %2752 = vmatpush3.bf16.msra.mxu0 %v3430_v27  ;;  %2767 = vmatprep.mubr.msk.bf16.mxu0 %vm3271_vm0, %v3270_v31 }
 0x220   : > { %2753 = vmatprep.subr.bf16.mxu0 %v3270_v31  ;;  %v396_v23 = vrot.slane %v3553_v52, %v395_v22  ;;  %v404_v22 = vrot.slane %v3553_v52, %v403_v34 }
 0x222   : > { %v3736_v25 = vadd.f32 %v3570_v62, %v396_v23  ;;  %v3740_v29 = vadd.f32 %v3577_v1, %v396_v23  ;;  %v3750_v1 = vadd.f32 %v3579_v3, %v400_v28  ;;  %v3755_v24 = vadd.f32 %v3555_v53, %v404_v22 }
 0x223   : > { %2754 = vmatpush3.bf16.msra.mxu0 %v3448_v33 }
 0x224   : > { %2755 = vmatprep.subr.bf16.mxu0 %v3270_v31 }
 0x227   : > { %2756 = vmatpush3.bf16.msra.mxu0 %v3461_v36 }
 0x228   : > { %2757 = vmatprep.subr.bf16.mxu0 %v3270_v31 }
 0x22b   : > { %2758 = vmatpush3.bf16.msra.mxu0 %v3472_v38 }
 0x22c   : > { %2759 = vmatprep.subr.bf16.mxu0 %v3270_v31 }
 0x22f   : > { %2760 = vmatpush3.bf16.msra.mxu0 %v3480_v39 }
 0x230   : > { %2761 = vmatprep.subr.bf16.mxu0 %v3270_v31 }
 0x233   : > { %2762 = vmatpush3.bf16.msra.mxu0 %v3487_v40 }
 0x234   : > { %2763 = vmatprep.subr.bf16.mxu0 %v3270_v31 }
 0x237   : > { %2764 = vmatpush3.bf16.msra.mxu0 %v3495_v41 }
 0x238   : > { %2765 = vmatprep.subr.bf16.mxu0 %v3270_v31 }
 0x23b   : > { %2766 = vmatpush3.bf16.msra.mxu0 %v3502_v42 }
 0x23c   : > { %2783 = vmatprep.subr.bf16.mxu0 %v3270_v31 }
 0x2b8   : > { %v1179_v13 = vpop.f32.mrb[8].mxu1 }
 0x2b9   : > { %v2749_v15 = vpop.f32.mrb[9].mxu1 }
 0x2ba   : > { %v1182_v16 = vpop.f32.mrb[10].mxu1 }
 0x2bb   : > { %v2750_v17 = vpop.f32.mrb[11].mxu1 }
 0x2d1   : > { %v966_v18 = vpop.f32.mrb[12].mxu0 }
 0x2d2   : > { %v2729_v19 = vpop.f32.mrb[13].mxu0 }
 0x2d3   : > { %v969_v20 = vpop.f32.mrb[14].mxu0 }
 0x2d4   : > { %v2730_v21 = vpop.f32.mrb[15].mxu0 }
 0x2d5   : > { %v3746_v21 = vadd.f32 %v3575_v0, %v400_v28  ;;  %v3759_v0 = vadd.f32 %v3558_v56, %v404_v22 }
 0x2d7   : > { %v1191_v52 = vadd.f32 %v1182_v16, %v3759_v0 }
 0x2f1   : > { %v1136_v26 = vpop.f32.mrb[16].mxu0 }
 0x2f2   : > { %v1186_v30 = vadd.f32 %v1136_v26, %v3736_v25  ;;  %v1138_v32 = vpop.f32.mrb[17].mxu0 }
 0x2f3   : > { %v1140_v37 = vpop.f32.mrb[18].mxu0  ;;  %v1187_v23 = vadd.f32 %v1138_v32, %v3746_v21 }
 0x2f4   : > { %v2537_v15 = vmul.f32 -1.442695, %v1186_v30  ;;  %v1189_v17 = vadd.f32 %v1140_v37, %v3740_v29  ;;  %v1142_v19 = vpop.f32.mrb[19].mxu0  ;;  %v1188_v30 = vadd.f32 %v1179_v13, %v3755_v24 }
 0x2f5   : > { %v1190_v50 = vadd.f32 %v1142_v19, %v3750_v1  ;;  %v2539_v26 = vmul.f32 -1.442695, %v1187_v23 }
 0x2f6   : > { %3076 = vpow2.f32 %v2537_v15  ;;  %v2538_v62 = vmul.f32 -1.442695, %v1189_v17 }
 0x2f7   : > { %v2540_v37 = vmul.f32 -1.442695, %v1190_v50 }
 0x2f8   : > { %3078 = vpow2.f32 %v2538_v62 }
 0x2f9   : > { %3080 = vpow2.f32 %v2539_v26 }
 0x2fa   : > { %3082 = vtanh.f32 %v1188_v30 }
 0x2fb   : > { %3084 = vpow2.f32 %v2540_v37 }
 0x300   : > { %v3077_v15 = vpop.eup %3076 }
 0x301   : > { %v1198_v3 = vadd.f32 1.0, %v3077_v15 }
 0x302   : > { %v3079_v28 = vpop.eup %3078 }
 0x303   : > { %3086 = vrcp.f32 %v1198_v3  ;;  %v1199_v32 = vadd.f32 1.0, %v3079_v28  ;;  %v3081_v53 = vpop.eup %3080 }
 0x304   : > { %3088 = vtanh.f32 %v1191_v52  ;;  %v3083_v34 = vpop.eup %3082  ;;  %v1210_v19 = vadd.f32 1.0, %v3081_v53 }
 0x305   : > { %3090 = vrcp.f32 %v1199_v32  ;;  %v3085_v17 = vpop.eup %3084 }
 0x306   : > { %v1211_v23 = vadd.f32 1.0, %v3085_v17  ;;  %3092 = vrcp.f32 %v1210_v19 }
 0x30d   : > { %v3087_v13 = vpop.eup %3086 }
 0x30e   : > { %v3089_v56 = vpop.eup %3088  ;;  %v1218_v62 = vmul.f32 %v3087_v13, %v3083_v34 }
 0x30f   : > { %v3091_v22 = vpop.eup %3090 }
 0x310   : > { %v1220_v50 = vadd.f32 %v1218_v62, %v966_v18  ;;  %v1219_v16 = vmul.f32 %v3091_v22, %v3089_v56  ;;  %v3093_v30 = vpop.eup %3092 }
 0x312   : > { %3094 = vtanh.f32 %v1220_v50  ;;  %v1221_v26 = vadd.f32 %v1219_v16, %v969_v20 }
 0x313   : > { %3096 = vrcp.f32 %v1211_v23 }
 0x314   : > { %3098 = vtanh.f32 %v1221_v26 }
 0x31c   : > { %v3095_v37 = vpop.eup %3094 }
 0x31d   : > { %v3097_v15 = vpop.eup %3096  ;;  %v1226_v3 = vmul.f32 %v3095_v37, %v3093_v30 }
 0x31e   : > { %v3099_v52 = vpop.eup %3098 }
 0x31f   : > { %v1227_v28 = vmul.f32 %v3099_v52, %v3097_v15 }
 0x321   : > { %v1232_v32 = vpack.c.bf16 %v1227_v28, %v1226_v3 }
 0x323   : > { %2768 = vmatmul.mubr.bf16.vlgmr.msra.gmra.mrb[20].mxu0 %v1232_v32  ;;  %2772 = vmatpush3.bf16.msra.mxu1 %v1232_v32 }
 0x324   : > { %2784 = vmatpush3.bf16.msra.mxu0 %v3515_v44  ;;  %2799 = vmatprep.mubr.msk.bf16.mxu0 %vm3271_vm0, %v3270_v31 }
 0x325   : > { %2785 = vmatprep.subr.bf16.mxu0 %v3270_v31  ;;  %2777 = vmatprep.subr.bf16.mxu1 %v3270_v31 }
 0x326   : > { %2774 = vmatmul.mubr.msk.bf16.vlgmr.msra.gmra.mrb[12].mxu1 %vm673_vm1, %v3573_v63 }
 0x327   : > { %2779 = vmatprep.mubr.msk.bf16.mxu1 %vm3271_vm0, %v3270_v31 }
 0x328   : > { %2786 = vmatpush3.bf16.msra.mxu0 %v3521_v45 }
 0x329   : > { %2787 = vmatprep.subr.bf16.mxu0 %v3270_v31 }
 0x32c   : > { %2788 = vmatpush3.bf16.msra.mxu0 %v3528_v46 }
 0x32d   : > { %2789 = vmatprep.subr.bf16.mxu0 %v3270_v31 }
 0x330   : > { %2790 = vmatpush3.bf16.msra.mxu0 %v3535_v47 }
 0x331   : > { %2791 = vmatprep.subr.bf16.mxu0 %v3270_v31 }
 0x334   : > { %2792 = vmatpush3.bf16.msra.mxu0 %v3543_v48 }
 0x335   : > { %2793 = vmatprep.subr.bf16.mxu0 %v3270_v31 }
 0x338   : > { %2794 = vmatpush3.bf16.msra.mxu0 %v3588_v8 }
 0x339   : > { %2795 = vmatprep.subr.bf16.mxu0 %v3270_v31 }
 0x33c   : > { %2796 = vmatpush3.bf16.msra.mxu0 %v3595_v9 }
 0x33d   : > { %2797 = vmatprep.subr.bf16.mxu0 %v3270_v31 }
 0x340   : > { %2798 = vmatpush3.bf16.msra.mxu0 %v3602_v10 }
 0x341   : > { %2823 = vmatprep.subr.bf16.mxu0 %v3270_v31 }
 0x3f6   : > { %v1267_v18 = vpop.f32.mrb[20].mxu0 }
 0x3f7   : > { %v1274_v20 = vadd.f32 %v1267_v18, %v3606_v11  ;;  %v2769_v53 = vpop.f32.mrb[21].mxu0 }
 0x3f8   : > { %v1270_v34 = vpop.f32.mrb[22].mxu0 }
 0x3f9   : > { %v2541_v17 = vmul.f32 -1.442695, %v1274_v20  ;;  %v1275_v13 = vadd.f32 %v1270_v34, %v3609_v14  ;;  %v2770_v19 = vpop.f32.mrb[23].mxu0  ;;  %v1326_v56 = vpop.f32.mrb[12].mxu1 }
 0x3fa   : > { %v2775_v62 = vpop.f32.mrb[13].mxu1 }
 0x3fb   : > { %3100 = vpow2.f32 %v2541_v17  ;;  %v2542_v22 = vmul.f32 -1.442695, %v1275_v13  ;;  %v1329_v23 = vpop.f32.mrb[14].mxu1 }
 0x3fc   : > { %v1375_v16 = vpack.c.bf16 %v1329_v23, %v1326_v56  ;;  %v2776_v30 = vpop.f32.mrb[15].mxu1 }
 0x3fd   : > { %3102 = vpow2.f32 %v2542_v22 }
 0x3fe   : > { %2800 = vmatmul.mubr.bf16.vlgmr.msra.gmra.mrb[24].mxu0 %v1375_v16 }
 0x3ff   : > { %2825 = vmatprep.mubr.msk.bf16.mxu0 %vm3271_vm0, %v3270_v31 }
 0x405   : > { %v3101_v37 = vpop.eup %3100 }
 0x406   : > { %v1282_v15 = vadd.f32 1.0, %v3101_v37 }
 0x407   : > { %v3103_v52 = vpop.eup %3102 }
 0x408   : > { %3104 = vrcp.f32 %v1282_v15  ;;  %v1283_v3 = vadd.f32 1.0, %v3103_v52 }
 0x40a   : > { %3106 = vrcp.f32 %v1283_v3 }
 0x412   : > { %v3105_v28 = vpop.eup %3104 }
 0x413   : > { %v1290_v18 = vmul.f32 %v3105_v28, %v1220_v50 }
 0x414   : > { %v3107_v32 = vpop.eup %3106 }
 0x415   : > { %v1291_v20 = vmul.f32 %v3107_v32, %v1221_v26 }
 0x417   : > { %v1333_v53 = vpack.c.bf16 %v1291_v20, %v1290_v18 }
 0x419   : > { %2778 = vmatpush3.bf16.msra.mxu1 %v1333_v53 }
 0x41a   : > { %1376 = vmatprep.subr.bf16.mxu1 %v3617_v35 }
 0x41c   : > { %2780 = vmatmul.mubr.msk.bf16.vlgmr.msra.gmra.mrb[16].mxu1 %vm673_vm1, %v3573_v63 }
 0x41d   : > { %1377 = vmatpush1.bf16.msra.mxu1 %v3622_v43  ;;  %1408 = vmatprep.mubr.bf16.mxu1 %v3269_v2 }
 0x41e   : > { %1378 = vmatprep.subr.bf16.mxu1 %v3628_v49 }
 0x421   : > { %1379 = vmatpush1.bf16.msra.mxu1 %v3636_v51 }
 0x422   : > { %1380 = vmatprep.subr.bf16.mxu1 %v3643_v54 }
 0x425   : > { %1381 = vmatpush1.bf16.msra.mxu1 %v3649_v55 }
 0x426   : > { %1382 = vmatprep.subr.bf16.mxu1 %v3655_v57 }
 0x429   : > { %1383 = vmatpush1.bf16.msra.mxu1 %v3661_v58 }
 0x42a   : > { %1384 = vmatprep.subr.bf16.mxu1 %v3667_v59 }
 0x42d   : > { %1385 = vmatpush1.bf16.msra.mxu1 %v3673_v60 }
 0x42e   : > { %1386 = vmatprep.subr.bf16.mxu1 %v3679_v61 }
 0x431   : > { %1387 = vmatpush1.bf16.msra.mxu1 %v3685_v4 }
 0x432   : > { %1388 = vmatprep.subr.bf16.mxu1 %v3691_v5 }
 0x435   : > { %1389 = vmatpush1.bf16.msra.mxu1 %v3697_v6 }
 0x436   : > { %1390 = vmatprep.subr.bf16.mxu1 %v3703_v7 }
 0x439   : > { %1391 = vmatpush1.bf16.msra.mxu1 %v3709_v12 }
 0x43a   : > { %2803 = vmatprep.subr.bf16.mxu1 %v3270_v31 }
 0x43c   : > { %1409 = vmatmul.mubr.bf16.vlgmr.msra.gmra.mrb[20].mxu1 %v1375_v16 }
 0x43d   : > { %2804 = vmatpush3.bf16.msra.mxu1 %v3430_v27  ;;  %2819 = vmatprep.mubr.msk.bf16.mxu1 %vm3271_vm0, %v3270_v31 }
 0x43e   : > { %2805 = vmatprep.subr.bf16.mxu1 %v3270_v31 }
 0x441   : > { %2806 = vmatpush3.bf16.msra.mxu1 %v3448_v33 }
 0x442   : > { %2807 = vmatprep.subr.bf16.mxu1 %v3270_v31 }
 0x445   : > { %2808 = vmatpush3.bf16.msra.mxu1 %v3461_v36 }
 0x446   : > { %2809 = vmatprep.subr.bf16.mxu1 %v3270_v31 }
 0x449   : > { %2810 = vmatpush3.bf16.msra.mxu1 %v3472_v38 }
 0x44a   : > { %2811 = vmatprep.subr.bf16.mxu1 %v3270_v31 }
 0x44d   : > { %2812 = vmatpush3.bf16.msra.mxu1 %v3480_v39 }
 0x44e   : > { %2813 = vmatprep.subr.bf16.mxu1 %v3270_v31 }
 0x451   : > { %2814 = vmatpush3.bf16.msra.mxu1 %v3487_v40 }
 0x452   : > { %2815 = vmatprep.subr.bf16.mxu1 %v3270_v31 }
 0x455   : > { %2816 = vmatpush3.bf16.msra.mxu1 %v3495_v41 }
 0x456   : > { %2817 = vmatprep.subr.bf16.mxu1 %v3270_v31 }
 0x459   : > { %2818 = vmatpush3.bf16.msra.mxu1 %v3502_v42 }
 0x45a   : > { %2835 = vmatprep.subr.bf16.mxu1 %v3270_v31 }
 0x4d1   : > { %v1453_v50 = vpop.f32.mrb[24].mxu0 }
 0x4d2   : > { %v2801_v26 = vpop.f32.mrb[25].mxu0  ;;  %v1462_v20 = vadd.f32 %v1453_v50, %v3755_v24 }
 0x4d3   : > { %v1456_v34 = vpop.f32.mrb[26].mxu0 }
 0x4d4   : > { %v2802_v17 = vpop.f32.mrb[27].mxu0 }
 0x4d5   : > { %v1465_v17 = vadd.f32 %v1456_v34, %v3759_v0 }
 0x4ef   : > { %v1368_v13 = vpop.f32.mrb[16].mxu1 }
 0x4f0   : > { %v2781_v19 = vpop.f32.mrb[17].mxu1 }
 0x4f1   : > { %v1371_v56 = vpop.f32.mrb[18].mxu1 }
 0x4f2   : > { %v2782_v62 = vpop.f32.mrb[19].mxu1 }
 0x50f   : > { %v1410_v22 = vpop.f32.mrb[20].mxu1 }
 0x510   : > { %v1460_v23 = vadd.f32 %v1410_v22, %v3736_v25  ;;  %v1412_v16 = vpop.f32.mrb[21].mxu1 }
 0x511   : > { %v1414_v30 = vpop.f32.mrb[22].mxu1  ;;  %v1461_v28 = vadd.f32 %v1412_v16, %v3746_v21 }
 0x512   : > { %v2545_v37 = vmul.f32 -1.442695, %v1460_v23  ;;  %v1463_v15 = vadd.f32 %v1414_v30, %v3740_v29  ;;  %v1416_v52 = vpop.f32.mrb[23].mxu1 }
 0x513   : > { %v1464_v32 = vadd.f32 %v1416_v52, %v3750_v1  ;;  %v2547_v18 = vmul.f32 -1.442695, %v1461_v28 }
 0x514   : > { %3108 = vpow2.f32 %v2545_v37  ;;  %v2546_v3 = vmul.f32 -1.442695, %v1463_v15 }
 0x515   : > { %v2548_v53 = vmul.f32 -1.442695, %v1464_v32 }
 0x516   : > { %3110 = vpow2.f32 %v2546_v3 }
 0x517   : > { %3112 = vpow2.f32 %v2547_v18 }
 0x518   : > { %3114 = vtanh.f32 %v1462_v20 }
 0x519   : > { %3116 = vpow2.f32 %v2548_v53 }
 0x51e   : > { %v3109_v26 = vpop.eup %3108 }
 0x51f   : > { %v1472_v19 = vadd.f32 1.0, %v3109_v26 }
 0x520   : > { %v3111_v62 = vpop.eup %3110 }
 0x521   : > { %3118 = vrcp.f32 %v1472_v19  ;;  %v1473_v22 = vadd.f32 1.0, %v3111_v62  ;;  %v3113_v23 = vpop.eup %3112 }
 0x522   : > { %3120 = vtanh.f32 %v1465_v17  ;;  %v3115_v16 = vpop.eup %3114  ;;  %v1484_v15 = vadd.f32 1.0, %v3113_v23 }
 0x523   : > { %3122 = vrcp.f32 %v1473_v22  ;;  %v3117_v30 = vpop.eup %3116 }
 0x524   : > { %v1485_v28 = vadd.f32 1.0, %v3117_v30  ;;  %3124 = vrcp.f32 %v1484_v15 }
 0x52b   : > { %v3119_v37 = vpop.eup %3118 }
 0x52c   : > { %v3121_v52 = vpop.eup %3120  ;;  %v1492_v50 = vmul.f32 %v3119_v37, %v3115_v16 }
 0x52d   : > { %v3123_v3 = vpop.eup %3122 }
 0x52e   : > { %v1494_v32 = vadd.f32 %v1492_v50, %v1368_v13  ;;  %v1493_v34 = vmul.f32 %v3123_v3, %v3121_v52  ;;  %v3125_v20 = vpop.eup %3124 }
 0x530   : > { %3126 = vtanh.f32 %v1494_v32  ;;  %v1495_v18 = vadd.f32 %v1493_v34, %v1371_v56 }
 0x531   : > { %3128 = vrcp.f32 %v1485_v28 }
 0x532   : > { %3130 = vtanh.f32 %v1495_v18 }
 0x53a   : > { %v3127_v53 = vpop.eup %3126 }
 0x53b   : > { %v3129_v26 = vpop.eup %3128  ;;  %v1500_v19 = vmul.f32 %v3127_v53, %v3125_v20 }
 0x53c   : > { %v3131_v17 = vpop.eup %3130 }
 0x53d   : > { %v1501_v62 = vmul.f32 %v3131_v17, %v3129_v26 }
 0x53f   : > { %v1506_v22 = vpack.c.bf16 %v1501_v62, %v1500_v19 }
 0x541   : > { %2820 = vmatmul.mubr.bf16.vlgmr.msra.gmra.mrb[24].mxu1 %v1506_v22  ;;  %2824 = vmatpush3.bf16.msra.mxu0 %v1506_v22 }
 0x542   : > { %2836 = vmatpush3.bf16.msra.mxu1 %v3515_v44  ;;  %2851 = vmatprep.mubr.msk.bf16.mxu1 %vm3271_vm0, %v3270_v31 }
 0x543   : > { %2837 = vmatprep.subr.bf16.mxu1 %v3270_v31  ;;  %2829 = vmatprep.subr.bf16.mxu0 %v3270_v31 }
 0x544   : > { %2826 = vmatmul.mubr.msk.bf16.vlgmr.msra.gmra.mrb[28].mxu0 %vm673_vm1, %v3573_v63 }
 0x545   : > { %2831 = vmatprep.mubr.msk.bf16.mxu0 %vm3271_vm0, %v3270_v31 }
 0x546   : > { %2838 = vmatpush3.bf16.msra.mxu1 %v3521_v45 }
 0x547   : > { %2839 = vmatprep.subr.bf16.mxu1 %v3270_v31 }
 0x54a   : > { %2840 = vmatpush3.bf16.msra.mxu1 %v3528_v46 }
 0x54b   : > { %2841 = vmatprep.subr.bf16.mxu1 %v3270_v31 }
 0x54e   : > { %2842 = vmatpush3.bf16.msra.mxu1 %v3535_v47 }
 0x54f   : > { %2843 = vmatprep.subr.bf16.mxu1 %v3270_v31 }
 0x552   : > { %2844 = vmatpush3.bf16.msra.mxu1 %v3543_v48 }
 0x553   : > { %2845 = vmatprep.subr.bf16.mxu1 %v3270_v31 }
 0x556   : > { %2846 = vmatpush3.bf16.msra.mxu1 %v3588_v8 }
 0x557   : > { %2847 = vmatprep.subr.bf16.mxu1 %v3270_v31 }
 0x55a   : > { %2848 = vmatpush3.bf16.msra.mxu1 %v3595_v9 }
 0x55b   : > { %2849 = vmatprep.subr.bf16.mxu1 %v3270_v31 }
 0x55e   : > { %2850 = vmatpush3.bf16.msra.mxu1 %v3602_v10 }
 0x55f   : > { %2875 = vmatprep.subr.bf16.mxu1 %v3270_v31 }
 0x614   : > { %v1541_v13 = vpop.f32.mrb[24].mxu1 }
 0x615   : > { %v1548_v56 = vadd.f32 %v1541_v13, %v3606_v11  ;;  %v2821_v23 = vpop.f32.mrb[25].mxu1 }
 0x616   : > { %v1544_v16 = vpop.f32.mrb[26].mxu1 }
 0x617   : > { %v2549_v30 = vmul.f32 -1.442695, %v1548_v56  ;;  %v1549_v37 = vadd.f32 %v1544_v16, %v3609_v14  ;;  %v2822_v15 = vpop.f32.mrb[27].mxu1  ;;  %v1600_v52 = vpop.f32.mrb[28].mxu0 }
 0x618   : > { %v2827_v50 = vpop.f32.mrb[29].mxu0 }
 0x619   : > { %3132 = vpow2.f32 %v2549_v30  ;;  %v2550_v3 = vmul.f32 -1.442695, %v1549_v37  ;;  %v1603_v28 = vpop.f32.mrb[30].mxu0 }
 0x61a   : > { %v1649_v34 = vpack.c.bf16 %v1603_v28, %v1600_v52  ;;  %v2828_v20 = vpop.f32.mrb[31].mxu0 }
 0x61b   : > { %3134 = vpow2.f32 %v2550_v3 }
 0x61c   : > { %2852 = vmatmul.mubr.bf16.vlgmr.msra.gmra.mrb[28].mxu1 %v1649_v34 }
 0x61d   : > { %2877 = vmatprep.mubr.msk.bf16.mxu1 %vm3271_vm0, %v3270_v31 }
 0x623   : > { %v3133_v53 = vpop.eup %3132 }
 0x624   : > { %v1556_v26 = vadd.f32 1.0, %v3133_v53 }
 0x625   : > { %v3135_v17 = vpop.eup %3134 }
 0x626   : > { %3136 = vrcp.f32 %v1556_v26  ;;  %v1557_v19 = vadd.f32 1.0, %v3135_v17 }
 0x628   : > { %3138 = vrcp.f32 %v1557_v19 }
 0x630   : > { %v3137_v62 = vpop.eup %3136 }
 0x631   : > { %v1564_v13 = vmul.f32 %v3137_v62, %v1494_v32 }
 0x632   : > { %v3139_v22 = vpop.eup %3138 }
 0x633   : > { %v1565_v56 = vmul.f32 %v3139_v22, %v1495_v18 }
 0x635   : > { %v1607_v23 = vpack.c.bf16 %v1565_v56, %v1564_v13 }
 0x637   : > { %2830 = vmatpush3.bf16.msra.mxu0 %v1607_v23 }
 0x638   : > { %1650 = vmatprep.subr.bf16.mxu0 %v3617_v35 }
 0x63a   : > { %2832 = vmatmul.mubr.msk.bf16.vlgmr.msra.gmra.mrb[32].mxu0 %vm673_vm1, %v3573_v63 }
 0x63b   : > { %1651 = vmatpush1.bf16.msra.mxu0 %v3622_v43  ;;  %1682 = vmatprep.mubr.bf16.mxu0 %v3269_v2 }
 0x63c   : > { %1652 = vmatprep.subr.bf16.mxu0 %v3628_v49 }
 0x63f   : > { %1653 = vmatpush1.bf16.msra.mxu0 %v3636_v51 }
 0x640   : > { %1654 = vmatprep.subr.bf16.mxu0 %v3643_v54 }
 0x643   : > { %1655 = vmatpush1.bf16.msra.mxu0 %v3649_v55 }
 0x644   : > { %1656 = vmatprep.subr.bf16.mxu0 %v3655_v57 }
 0x647   : > { %1657 = vmatpush1.bf16.msra.mxu0 %v3661_v58 }
 0x648   : > { %1658 = vmatprep.subr.bf16.mxu0 %v3667_v59 }
 0x64b   : > { %1659 = vmatpush1.bf16.msra.mxu0 %v3673_v60 }
 0x64c   : > { %1660 = vmatprep.subr.bf16.mxu0 %v3679_v61 }
 0x64f   : > { %1661 = vmatpush1.bf16.msra.mxu0 %v3685_v4 }
 0x650   : > { %1662 = vmatprep.subr.bf16.mxu0 %v3691_v5 }
 0x653   : > { %1663 = vmatpush1.bf16.msra.mxu0 %v3697_v6 }
 0x654   : > { %1664 = vmatprep.subr.bf16.mxu0 %v3703_v7 }
 0x657   : > { %1665 = vmatpush1.bf16.msra.mxu0 %v3709_v12 }
 0x658   : > { %2855 = vmatprep.subr.bf16.mxu0 %v3270_v31 }
 0x65a   : > { %1683 = vmatmul.mubr.bf16.vlgmr.msra.gmra.mrb[36].mxu0 %v1649_v34 }
 0x65b   : > { %2856 = vmatpush3.bf16.msra.mxu0 %v3430_v27  ;;  %2871 = vmatprep.mubr.msk.bf16.mxu0 %vm3271_vm0, %v3270_v31 }
 0x65c   : > { %2857 = vmatprep.subr.bf16.mxu0 %v3270_v31 }
 0x65f   : > { %2858 = vmatpush3.bf16.msra.mxu0 %v3448_v33 }
 0x660   : > { %2859 = vmatprep.subr.bf16.mxu0 %v3270_v31 }
 0x663   : > { %2860 = vmatpush3.bf16.msra.mxu0 %v3461_v36 }
 0x664   : > { %2861 = vmatprep.subr.bf16.mxu0 %v3270_v31 }
 0x667   : > { %2862 = vmatpush3.bf16.msra.mxu0 %v3472_v38 }
 0x668   : > { %2863 = vmatprep.subr.bf16.mxu0 %v3270_v31 }
 0x66b   : > { %2864 = vmatpush3.bf16.msra.mxu0 %v3480_v39 }
 0x66c   : > { %2865 = vmatprep.subr.bf16.mxu0 %v3270_v31 }
 0x66f   : > { %2866 = vmatpush3.bf16.msra.mxu0 %v3487_v40 }
 0x670   : > { %2867 = vmatprep.subr.bf16.mxu0 %v3270_v31 }
 0x673   : > { %2868 = vmatpush3.bf16.msra.mxu0 %v3495_v41 }
 0x674   : > { %2869 = vmatprep.subr.bf16.mxu0 %v3270_v31 }
 0x677   : > { %2870 = vmatpush3.bf16.msra.mxu0 %v3502_v42 }
 0x678   : > { %2887 = vmatprep.subr.bf16.mxu0 %v3270_v31 }
 0x6ef   : > { %v1727_v27 = vpop.f32.mrb[28].mxu1 }
 0x6f0   : > { %v2853_v33 = vpop.f32.mrb[29].mxu1  ;;  %v1736_v20 = vadd.f32 %v1727_v27, %v3755_v24 }
 0x6f1   : > { %v1730_v36 = vpop.f32.mrb[30].mxu1 }
 0x6f2   : > { %v2854_v38 = vpop.f32.mrb[31].mxu1  ;;  %v1739_v17 = vadd.f32 %v1730_v36, %v3759_v0 }
 0x70d   : > { %v1642_v32 = vpop.f32.mrb[32].mxu0 }
 0x70e   : > { %v2833_v39 = vpop.f32.mrb[33].mxu0 }
 0x70f   : > { %v1645_v18 = vpop.f32.mrb[34].mxu0 }
 0x710   : > { %v2834_v16 = vpop.f32.mrb[35].mxu0 }
 0x72d   : > { %v1684_v30 = vpop.f32.mrb[36].mxu0 }
 0x72e   : > { %v1734_v40 = vadd.f32 %v1684_v30, %v3736_v25  ;;  %v1686_v37 = vpop.f32.mrb[37].mxu0 }
 0x72f   : > { %v1688_v15 = vpop.f32.mrb[38].mxu0  ;;  %v1735_v3 = vadd.f32 %v1686_v37, %v3746_v21 }
 0x730   : > { %v2553_v41 = vmul.f32 -1.442695, %v1734_v40  ;;  %v1737_v52 = vadd.f32 %v1688_v15, %v3740_v29  ;;  %v1690_v50 = vpop.f32.mrb[39].mxu0 }
 0x731   : > { %v1738_v28 = vadd.f32 %v1690_v50, %v3750_v1  ;;  %v2555_v34 = vmul.f32 -1.442695, %v1735_v3 }
 0x732   : > { %3140 = vpow2.f32 %v2553_v41  ;;  %v2554_v42 = vmul.f32 -1.442695, %v1737_v52 }
 0x733   : > { %v2556_v53 = vmul.f32 -1.442695, %v1738_v28 }
 0x734   : > { %3142 = vpow2.f32 %v2554_v42 }
 0x735   : > { %3144 = vpow2.f32 %v2555_v34 }
 0x736   : > { %3146 = vtanh.f32 %v1736_v20 }
 0x737   : > { %3148 = vpow2.f32 %v2556_v53 }
 0x73c   : > { %v3141_v26 = vpop.eup %3140 }
 0x73d   : > { %v1746_v19 = vadd.f32 1.0, %v3141_v26 }
 0x73e   : > { %v3143_v62 = vpop.eup %3142 }
 0x73f   : > { %3150 = vrcp.f32 %v1746_v19  ;;  %v1747_v22 = vadd.f32 1.0, %v3143_v62  ;;  %v3145_v13 = vpop.eup %3144 }
 0x740   : > { %3152 = vtanh.f32 %v1739_v17  ;;  %v3147_v56 = vpop.eup %3146  ;;  %v1758_v38 = vadd.f32 1.0, %v3145_v13 }
 0x741   : > { %3154 = vrcp.f32 %v1747_v22  ;;  %v3149_v23 = vpop.eup %3148 }
 0x742   : > { %v1759_v30 = vadd.f32 1.0, %v3149_v23  ;;  %3156 = vrcp.f32 %v1758_v38 }
 0x749   : > { %v3151_v33 = vpop.eup %3150 }
 0x74a   : > { %v3153_v39 = vpop.eup %3152  ;;  %v1766_v27 = vmul.f32 %v3151_v33, %v3147_v56  ;;  %v3933_v33 = vld [vmem:[%s3372_s14] sm:$0xff]  }
 0x74b   : > { %v3155_v16 = vpop.eup %3154 }
 0x74c   : > { %v1768_v40 = vadd.f32 %v1766_v27, %v1642_v32  ;;  %v1767_v36 = vmul.f32 %v3155_v16, %v3153_v39  ;;  %v3157_v15 = vpop.eup %3156 }
 0x74e   : > { %3158 = vtanh.f32 %v1768_v40  ;;  %v1769_v37 = vadd.f32 %v1767_v36, %v1645_v18 }
 0x74f   : > { %3160 = vrcp.f32 %v1759_v30 }
 0x750   : > { %3162 = vtanh.f32 %v1769_v37 }
 0x758   : > { %v3159_v41 = vpop.eup %3158 }
 0x759   : > { %v3161_v52 = vpop.eup %3160  ;;  %v1774_v42 = vmul.f32 %v3159_v41, %v3157_v15 }
 0x75a   : > { %v3163_v50 = vpop.eup %3162 }
 0x75b   : > { %v1775_v3 = vmul.f32 %v3163_v50, %v3161_v52 }
 0x75d   : > { %v1780_v28 = vpack.c.bf16 %v1775_v3, %v1774_v42 }
 0x75f   : > { %2872 = vmatmul.mubr.bf16.vlgmr.msra.gmra.mrb[40].mxu0 %v1780_v28  ;;  %2876 = vmatpush3.bf16.msra.mxu1 %v1780_v28 }
 0x760   : > { %2888 = vmatpush3.bf16.msra.mxu0 %v3515_v44  ;;  %2903 = vmatprep.mubr.msk.bf16.mxu0 %vm3271_vm0, %v3270_v31 }
 0x761   : > { %2889 = vmatprep.subr.bf16.mxu0 %v3270_v31  ;;  %2881 = vmatprep.subr.bf16.mxu1 %v3270_v31 }
 0x762   : > { %2878 = vmatmul.mubr.msk.bf16.vlgmr.msra.gmra.mrb[32].mxu1 %vm673_vm1, %v3573_v63 }
 0x763   : > { %2883 = vmatprep.mubr.msk.bf16.mxu1 %vm3271_vm0, %v3270_v31 }
 0x764   : > { %2890 = vmatpush3.bf16.msra.mxu0 %v3521_v45 }
 0x765   : > { %2891 = vmatprep.subr.bf16.mxu0 %v3270_v31 }
 0x768   : > { %2892 = vmatpush3.bf16.msra.mxu0 %v3528_v46 }
 0x769   : > { %2893 = vmatprep.subr.bf16.mxu0 %v3270_v31 }
 0x76c   : > { %2894 = vmatpush3.bf16.msra.mxu0 %v3535_v47 }
 0x76d   : > { %2895 = vmatprep.subr.bf16.mxu0 %v3270_v31 }
 0x770   : > { %2896 = vmatpush3.bf16.msra.mxu0 %v3543_v48 }
 0x771   : > { %2897 = vmatprep.subr.bf16.mxu0 %v3270_v31 }
 0x774   : > { %2898 = vmatpush3.bf16.msra.mxu0 %v3588_v8 }
 0x775   : > { %2899 = vmatprep.subr.bf16.mxu0 %v3270_v31 }
 0x778   : > { %2900 = vmatpush3.bf16.msra.mxu0 %v3595_v9 }
 0x779   : > { %2901 = vmatprep.subr.bf16.mxu0 %v3270_v31 }
 0x77c   : > { %2902 = vmatpush3.bf16.msra.mxu0 %v3602_v10 }
 0x77d   : > { %2927 = vmatprep.subr.bf16.mxu0 %v3270_v31 }
 0x832   : > { %v1815_v44 = vpop.f32.mrb[40].mxu0 }
 0x833   : > { %v1822_v45 = vadd.f32 %v1815_v44, %v3606_v11  ;;  %v2873_v46 = vpop.f32.mrb[41].mxu0 }
 0x834   : > { %v1818_v47 = vpop.f32.mrb[42].mxu0 }
 0x835   : > { %v2557_v48 = vmul.f32 -1.442695, %v1822_v45  ;;  %v1823_v63 = vadd.f32 %v1818_v47, %v3609_v14  ;;  %v2874_v32 = vpop.f32.mrb[43].mxu0  ;;  %v1874_v8 = vpop.f32.mrb[32].mxu1 }
 0x836   : > { %v2879_v18 = vpop.f32.mrb[33].mxu1 }
 0x837   : > { %3164 = vpow2.f32 %v2557_v48  ;;  %v2558_v34 = vmul.f32 -1.442695, %v1823_v63  ;;  %v1877_v9 = vpop.f32.mrb[34].mxu1 }
 0x838   : > { %v1923_v20 = vpack.c.bf16 %v1877_v9, %v1874_v8  ;;  %v2880_v53 = vpop.f32.mrb[35].mxu1 }
 0x839   : > { %3166 = vpow2.f32 %v2558_v34 }
 0x83a   : > { %2904 = vmatmul.mubr.bf16.vlgmr.msra.gmra.mrb[44].mxu0 %v1923_v20 }
 0x83b   : > { %2929 = vmatprep.mubr.msk.bf16.mxu0 %vm3271_vm0, %v3270_v31 }
 0x841   : > { %v3165_v10 = vpop.eup %3164 }
 0x842   : > { %v1830_v26 = vadd.f32 1.0, %v3165_v10 }
 0x843   : > { %v3167_v17 = vpop.eup %3166 }
 0x844   : > { %3168 = vrcp.f32 %v1830_v26  ;;  %v1831_v19 = vadd.f32 1.0, %v3167_v17 }
 0x846   : > { %3170 = vrcp.f32 %v1831_v19 }
 0x84e   : > { %v3169_v62 = vpop.eup %3168 }
 0x84f   : > { %v1838_v13 = vmul.f32 %v3169_v62, %v1768_v40 }
 0x850   : > { %v3171_v22 = vpop.eup %3170 }
 0x851   : > { %v1839_v56 = vmul.f32 %v3171_v22, %v1769_v37 }
 0x853   : > { %v1881_v23 = vpack.c.bf16 %v1839_v56, %v1838_v13 }
 0x855   : > { %2882 = vmatpush3.bf16.msra.mxu1 %v1881_v23 }
 0x856   : > { %1924 = vmatprep.subr.bf16.mxu1 %v3617_v35  ;;  %v3229_v35 = vld [vmem:[%s4121_s7] sm:$0xff]  }
 0x858   : > { %2884 = vmatmul.mubr.msk.bf16.vlgmr.msra.gmra.mrb[36].mxu1 %vm673_vm1, %v3933_v33 }
 0x859   : > { %1925 = vmatpush1.bf16.msra.mxu1 %v3622_v43  ;;  %1956 = vmatprep.mubr.bf16.mxu1 %v3269_v2  ;;  %v3230_v43 = vld [vmem:[%s4121_s7 + $0x8] sm:$0xff]  }
 0x85a   : > { %1926 = vmatprep.subr.bf16.mxu1 %v3628_v49  ;;  %v3231_v49 = vld [vmem:[%s4121_s7 + $0x10] sm:$0xff]  }
 0x85d   : > { %1927 = vmatpush1.bf16.msra.mxu1 %v3636_v51  ;;  %v3232_v51 = vld [vmem:[%s4121_s7 + $0x18] sm:$0xff]  }
 0x85e   : > { %1928 = vmatprep.subr.bf16.mxu1 %v3643_v54  ;;  %v3233_v54 = vld [vmem:[%s4121_s7 + $0x20] sm:$0xff]  }
 0x861   : > { %1929 = vmatpush1.bf16.msra.mxu1 %v3649_v55  ;;  %v3234_v55 = vld [vmem:[%s4121_s7 + $0x28] sm:$0xff]  }
 0x862   : > { %1930 = vmatprep.subr.bf16.mxu1 %v3655_v57  ;;  %v3235_v57 = vld [vmem:[%s4121_s7 + $0x30] sm:$0xff]  }
 0x865   : > { %1931 = vmatpush1.bf16.msra.mxu1 %v3661_v58  ;;  %v3236_v58 = vld [vmem:[%s4121_s7 + $0x38] sm:$0xff]  }
 0x866   : > { %1932 = vmatprep.subr.bf16.mxu1 %v3667_v59 }
 0x869   : > { %1933 = vmatpush1.bf16.msra.mxu1 %v3673_v60 }
 0x86a   : > { %1934 = vmatprep.subr.bf16.mxu1 %v3679_v61 }
 0x86d   : > { %1935 = vmatpush1.bf16.msra.mxu1 %v3685_v4 }
 0x86e   : > { %1936 = vmatprep.subr.bf16.mxu1 %v3691_v5 }
 0x871   : > { %1937 = vmatpush1.bf16.msra.mxu1 %v3697_v6 }
 0x872   : > { %1938 = vmatprep.subr.bf16.mxu1 %v3703_v7 }
 0x875   : > { %1939 = vmatpush1.bf16.msra.mxu1 %v3709_v12 }
 0x876   : > { %2907 = vmatprep.subr.bf16.mxu1 %v3270_v31 }
 0x878   : > { %1957 = vmatmul.mubr.bf16.vlgmr.msra.gmra.mrb[40].mxu1 %v1923_v20 }
 0x879   : > { %2908 = vmatpush3.bf16.msra.mxu1 %v3229_v35  ;;  %2923 = vmatprep.mubr.msk.bf16.mxu1 %vm3271_vm0, %v3270_v31  ;;  %v3237_v35 = vld [vmem:[%s4120_s6 + $0x8] ss:$12 sps:$4 sm:$0xff]  }
 0x87a   : > { %2909 = vmatprep.subr.bf16.mxu1 %v3270_v31 }
 0x87d   : > { %2910 = vmatpush3.bf16.msra.mxu1 %v3230_v43  ;;  %v3238_v43 = vld [vmem:[%s4120_s6 + $0x20] ss:$12 sps:$4 sm:$0xff]  }
 0x87e   : > { %2911 = vmatprep.subr.bf16.mxu1 %v3270_v31 }
 0x881   : > { %2912 = vmatpush3.bf16.msra.mxu1 %v3231_v49  ;;  %v3239_v49 = vld [vmem:[%s4120_s6 + $0x38] ss:$12 sps:$4 sm:$0xff]  }
 0x882   : > { %2913 = vmatprep.subr.bf16.mxu1 %v3270_v31 }
 0x885   : > { %2914 = vmatpush3.bf16.msra.mxu1 %v3232_v51  ;;  %v3240_v51 = vld [vmem:[%s4120_s6 + $0x50] ss:$12 sps:$4 sm:$0xff]  }
 0x886   : > { %2915 = vmatprep.subr.bf16.mxu1 %v3270_v31 }
 0x889   : > { %2916 = vmatpush3.bf16.msra.mxu1 %v3233_v54  ;;  %v3241_v54 = vld [vmem:[%s4120_s6 + $0x68] ss:$12 sps:$4 sm:$0xff]  }
 0x88a   : > { %2917 = vmatprep.subr.bf16.mxu1 %v3270_v31 }
 0x88d   : > { %2918 = vmatpush3.bf16.msra.mxu1 %v3234_v55  ;;  %v3242_v55 = vld [vmem:[%s4120_s6 + $0x80] ss:$12 sps:$4 sm:$0xff]  }
 0x88e   : > { %2919 = vmatprep.subr.bf16.mxu1 %v3270_v31 }
 0x891   : > { %2920 = vmatpush3.bf16.msra.mxu1 %v3235_v57  ;;  %v3243_v57 = vld [vmem:[%s4120_s6 + $0x98] ss:$12 sps:$4 sm:$0xff]  }
 0x892   : > { %2921 = vmatprep.subr.bf16.mxu1 %v3270_v31 }
 0x895   : > { %2922 = vmatpush3.bf16.msra.mxu1 %v3236_v58  ;;  %v3244_v58 = vld [vmem:[%s4120_s6 + $0xb0] ss:$12 sps:$4 sm:$0xff]  }
 0x896   : > { %2939 = vmatprep.subr.bf16.mxu1 %v3270_v31 }
 0x90d   : > { %v2001_v59 = vpop.f32.mrb[44].mxu0 }
 0x90e   : > { %v2905_v60 = vpop.f32.mrb[45].mxu0  ;;  %v2010_v50 = vadd.f32 %v2001_v59, %v3755_v24 }
 0x90f   : > { %v2004_v61 = vpop.f32.mrb[46].mxu0 }
 0x910   : > { %v2906_v4 = vpop.f32.mrb[47].mxu0  ;;  %v2013_v28 = vadd.f32 %v2004_v61, %v3759_v0 }
 0x92b   : > { %v1916_v5 = vpop.f32.mrb[36].mxu1 }
 0x92c   : > { %v2885_v6 = vpop.f32.mrb[37].mxu1 }
 0x92d   : > { %v1919_v7 = vpop.f32.mrb[38].mxu1 }
 0x92e   : > { %v2886_v12 = vpop.f32.mrb[39].mxu1 }
 0x94b   : > { %v1958_v38 = vpop.f32.mrb[40].mxu1 }
 0x94c   : > { %v2008_v39 = vadd.f32 %v1958_v38, %v3736_v25  ;;  %v1960_v27 = vpop.f32.mrb[41].mxu1 }
 0x94d   : > { %v1962_v16 = vpop.f32.mrb[42].mxu1  ;;  %v2009_v15 = vadd.f32 %v1960_v27, %v3746_v21 }
 0x94e   : > { %v2561_v30 = vmul.f32 -1.442695, %v2008_v39  ;;  %v2011_v40 = vadd.f32 %v1962_v16, %v3740_v29  ;;  %v1964_v36 = vpop.f32.mrb[43].mxu1 }
 0x94f   : > { %v2012_v41 = vadd.f32 %v1964_v36, %v3750_v1  ;;  %v2563_v52 = vmul.f32 -1.442695, %v2009_v15 }
 0x950   : > { %3172 = vpow2.f32 %v2561_v30  ;;  %v2562_v37 = vmul.f32 -1.442695, %v2011_v40 }
 0x951   : > { %v2564_v42 = vmul.f32 -1.442695, %v2012_v41 }
 0x952   : > { %3174 = vpow2.f32 %v2562_v37 }
 0x953   : > { %3176 = vpow2.f32 %v2563_v52 }
 0x954   : > { %3178 = vtanh.f32 %v2010_v50 }
 0x955   : > { %3180 = vpow2.f32 %v2564_v42  ;;  %v3245_v42 = vld [vmem:[%s4120_s6 + $0x4] ss:$12 sps:$4 sm:$0xff]  }
 0x95a   : > { %v3173_v3 = vpop.eup %3172 }
 0x95b   : > { %v2020_v44 = vadd.f32 1.0, %v3173_v3  ;;  %v3246_v3 = vld [vmem:[%s4120_s6] ss:$12 sps:$4 sm:$0xff]  }
 0x95c   : > { %v3175_v45 = vpop.eup %3174 }
 0x95d   : > { %3182 = vrcp.f32 %v2020_v44  ;;  %v2021_v46 = vadd.f32 1.0, %v3175_v45  ;;  %v3177_v47 = vpop.eup %3176  ;;  %v3248_v44 = vld [vmem:[%s4120_s6 + $0x18] ss:$12 sps:$4 sm:$0xff]   ;;  %v3250_v45 = vld [vmem:[%s4120_s6 + $0x30] ss:$12 sps:$4 sm:$0xff]  }
 0x95e   : > { %3184 = vtanh.f32 %v2013_v28  ;;  %v3179_v48 = vpop.eup %3178  ;;  %v2032_v8 = vadd.f32 1.0, %v3177_v47  ;;  %v3247_v28 = vld [vmem:[%s4120_s6 + $0x1c] ss:$12 sps:$4 sm:$0xff]   ;;  %v3253_v47 = vld [vmem:[%s4120_s6 + $0x64] ss:$12 sps:$4 sm:$0xff]  }
 0x95f   : > { %3186 = vrcp.f32 %v2021_v46  ;;  %v3181_v63 = vpop.eup %3180  ;;  %v3252_v46 = vld [vmem:[%s4120_s6 + $0x48] ss:$12 sps:$4 sm:$0xff]  }
 0x960   : > { %v2033_v20 = vadd.f32 1.0, %v3181_v63  ;;  %3188 = vrcp.f32 %v2032_v8  ;;  %v3255_v63 = vld [vmem:[%s4120_s6 + $0x7c] ss:$12 sps:$4 sm:$0xff]   ;;  %v3257_v8 = vld [vmem:[%s4120_s6 + $0x94] ss:$12 sps:$4 sm:$0xff]  }
 0x967   : > { %v3183_v32 = vpop.eup %3182 }
 0x968   : > { %v3185_v18 = vpop.eup %3184  ;;  %v2040_v34 = vmul.f32 %v3183_v32, %v3179_v48  ;;  %v3254_v48 = vld [vmem:[%s4120_s6 + $0x60] ss:$12 sps:$4 sm:$0xff]   ;;  %v3256_v32 = vld [vmem:[%s4120_s6 + $0x78] ss:$12 sps:$4 sm:$0xff]  }
 0x969   : > { %v3187_v9 = vpop.eup %3186 }
 0x96a   : > { %v3994_v53 = vadd.f32 %v2040_v34, %v1916_v5  ;;  %v2041_v10 = vmul.f32 %v3187_v9, %v3185_v18  ;;  %v3189_v17 = vpop.eup %3188  ;;  %v3258_v18 = vld [vmem:[%s4120_s6 + $0x90] ss:$12 sps:$4 sm:$0xff]   ;;  %v3259_v34 = vld [vmem:[%s4120_s6 + $0xac] ss:$12 sps:$4 sm:$0xff]   ;;  %v3260_v9 = vld [vmem:[%s4120_s6 + $0xa8] ss:$12 sps:$4 sm:$0xff]  }
 0x96c   : > { %3190 = vtanh.f32 %v3994_v53  ;;  %v3997_v26 = vadd.f32 %v2041_v10, %v1919_v7 }
 0x96d   : > { %3192 = vrcp.f32 %v2033_v20 }
 0x96e   : > { %3194 = vtanh.f32 %v3997_v26 }
 0x976   : > { %v3191_v19 = vpop.eup %3190 }
 0x977   : > { %v3193_v62 = vpop.eup %3192  ;;  %v2048_v13 = vmul.f32 %v3191_v19, %v3189_v17 }
 0x978   : > { %v3195_v22 = vpop.eup %3194 }
 0x979   : > { %v2049_v56 = vmul.f32 %v3195_v22, %v3193_v62 }
 0x97b   : > { %v2054_v23 = vpack.c.bf16 %v2049_v56, %v2048_v13 }
 0x97d   : > { %2924 = vmatmul.mubr.bf16.vlgmr.msra.gmra.mrb[44].mxu1 %v2054_v23  ;;  %2928 = vmatpush3.bf16.msra.mxu0 %v2054_v23 }
 0x97e   : > { %2940 = vmatpush3.bf16.msra.mxu1 %v3237_v35  ;;  %2955 = vmatprep.mubr.msk.bf16.mxu1 %vm3271_vm0, %v3270_v31 }
 0x97f   : > { %2941 = vmatprep.subr.bf16.mxu1 %v3270_v31  ;;  %2933 = vmatprep.subr.bf16.mxu0 %v3270_v31 }
 0x980   : > { %2930 = vmatmul.mubr.msk.bf16.vlgmr.msra.gmra.mrb[48].mxu0 %vm673_vm1, %v3933_v33 }
 0x981   : > { %2935 = vmatprep.mubr.msk.bf16.mxu0 %vm3271_vm0, %v3270_v31 }
 0x982   : > { %2942 = vmatpush3.bf16.msra.mxu1 %v3238_v43 }
 0x983   : > { %2943 = vmatprep.subr.bf16.mxu1 %v3270_v31 }
 0x986   : > { %2944 = vmatpush3.bf16.msra.mxu1 %v3239_v49 }
 0x987   : > { %2945 = vmatprep.subr.bf16.mxu1 %v3270_v31 }
 0x98a   : > { %2946 = vmatpush3.bf16.msra.mxu1 %v3240_v51 }
 0x98b   : > { %2947 = vmatprep.subr.bf16.mxu1 %v3270_v31 }
 0x98e   : > { %2948 = vmatpush3.bf16.msra.mxu1 %v3241_v54 }
 0x98f   : > { %2949 = vmatprep.subr.bf16.mxu1 %v3270_v31 }
 0x992   : > { %2950 = vmatpush3.bf16.msra.mxu1 %v3242_v55 }
 0x993   : > { %2951 = vmatprep.subr.bf16.mxu1 %v3270_v31 }
 0x996   : > { %2952 = vmatpush3.bf16.msra.mxu1 %v3243_v57 }
 0x997   : > { %2953 = vmatprep.subr.bf16.mxu1 %v3270_v31 }
 0x99a   : > { %2954 = vmatpush3.bf16.msra.mxu1 %v3244_v58 }
 0xa50   : > { %v2089_v59 = vpop.f32.mrb[44].mxu1 }
 0xa51   : > { %v2096_v60 = vadd.f32 %v2089_v59, %v3606_v11  ;;  %v2925_v61 = vpop.f32.mrb[45].mxu1 }
 0xa52   : > { %v2092_v4 = vpop.f32.mrb[46].mxu1 }
 0xa53   : > { %v2565_v5 = vmul.f32 -1.442695, %v2096_v60  ;;  %v2097_v6 = vadd.f32 %v2092_v4, %v3609_v14  ;;  %v2926_v7 = vpop.f32.mrb[47].mxu1  ;;  %v2148_v12 = vpop.f32.mrb[48].mxu0 }
 0xa54   : > { %v2931_v38 = vpop.f32.mrb[49].mxu0 }
 0xa55   : > { %3196 = vpow2.f32 %v2565_v5  ;;  %v2566_v39 = vmul.f32 -1.442695, %v2097_v6  ;;  %v2151_v27 = vpop.f32.mrb[50].mxu0 }
 0xa56   : > { %v2197_v16 = vpack.c.bf16 %v2151_v27, %v2148_v12  ;;  %v2932_v30 = vpop.f32.mrb[51].mxu0 }
 0xa57   : > { %3198 = vpow2.f32 %v2566_v39 }
 0xa58   : > { %2956 = vmatmul.mubr.bf16.vlgmr.msra.gmra.mrb[48].mxu1 %v2197_v16 }
 0xa5f   : > { %v3197_v40 = vpop.eup %3196 }
 0xa60   : > { %v2104_v36 = vadd.f32 1.0, %v3197_v40 }
 0xa61   : > { %v3199_v37 = vpop.eup %3198 }
 0xa62   : > { %3200 = vrcp.f32 %v2104_v36  ;;  %v2105_v11 = vadd.f32 1.0, %v3199_v37 }
 0xa64   : > { %3202 = vrcp.f32 %v2105_v11 }
 0xa6c   : > { %v3201_v15 = vpop.eup %3200 }
 0xa6d   : > { %v2112_v14 = vmul.f32 %v3201_v15, %v3994_v53 }
 0xa6e   : > { %v3203_v41 = vpop.eup %3202 }
 0xa6f   : > { %v2113_v52 = vmul.f32 %v3203_v41, %v3997_v26 }
 0xa71   : > { %v2155_v50 = vpack.c.bf16 %v2113_v52, %v2112_v14  ;;  %v2326_v14 = vld [vmem:[%s352_s12] sm:$0x1] }
 0xa73   : > { %2934 = vmatpush3.bf16.msra.mxu0 %v2155_v50 }
 0xa74   : > { %2198 = vmatprep.subr.bf16.mxu0 %v3245_v42 }
 0xa76   : > { %2936 = vmatmul.mubr.msk.bf16.vlgmr.msra.gmra.mrb[52].mxu0 %vm673_vm1, %v3933_v33  ;;  %v3249_v33 = vld [vmem:[%s4120_s6 + $0x34] ss:$12 sps:$4 sm:$0xff]  }
 0xa77   : > { %2199 = vmatpush1.bf16.msra.mxu0 %v3246_v3  ;;  %2230 = vmatprep.mubr.bf16.mxu0 %v3269_v2  ;;  %v3251_v2 = vld [vmem:[%s4120_s6 + $0x4c] ss:$12 sps:$4 sm:$0xff]  }
 0xa78   : > { %2200 = vmatprep.subr.bf16.mxu0 %v3247_v28 }
 0xa7b   : > { %2201 = vmatpush1.bf16.msra.mxu0 %v3248_v44 }
 0xa7c   : > { %2202 = vmatprep.subr.bf16.mxu0 %v3249_v33 }
 0xa7f   : > { %2203 = vmatpush1.bf16.msra.mxu0 %v3250_v45 }
 0xa80   : > { %2204 = vmatprep.subr.bf16.mxu0 %v3251_v2 }
 0xa83   : > { %2205 = vmatpush1.bf16.msra.mxu0 %v3252_v46 }
 0xa84   : > { %2206 = vmatprep.subr.bf16.mxu0 %v3253_v47 }
 0xa87   : > { %2207 = vmatpush1.bf16.msra.mxu0 %v3254_v48 }
 0xa88   : > { %2208 = vmatprep.subr.bf16.mxu0 %v3255_v63 }
 0xa8b   : > { %2209 = vmatpush1.bf16.msra.mxu0 %v3256_v32 }
 0xa8c   : > { %2210 = vmatprep.subr.bf16.mxu0 %v3257_v8 }
 0xa8f   : > { %2211 = vmatpush1.bf16.msra.mxu0 %v3258_v18 }
 0xa90   : > { %2212 = vmatprep.subr.bf16.mxu0 %v3259_v34 }
 0xa93   : > { %2213 = vmatpush1.bf16.msra.mxu0 %v3260_v9 }
 0xa94   : > { %2959 = vmatprep.subr.bf16.mxu0 %v3270_v31 }
 0xa96   : > { %2231 = vmatmul.mubr.bf16.vlgmr.msra.gmra.mrb[56].mxu0 %v2197_v16 }
 0xa97   : > { %2961 = vmatprep.mubr.msk.bf16.mxu0 %vm3271_vm0, %v3270_v31 }
 0xb2b   : > { %v2275_v20 = vpop.f32.mrb[48].mxu1 }
 0xb2c   : > { %v2957_v53 = vpop.f32.mrb[49].mxu1  ;;  %v2284_v58 = vadd.f32 %v2275_v20, %v3755_v24 }
 0xb2d   : > { %v2278_v10 = vpop.f32.mrb[50].mxu1 }
 0xb2e   : > { %v2958_v26 = vpop.f32.mrb[51].mxu1 }
 0xb49   : > { %v2190_v17 = vpop.f32.mrb[52].mxu0 }
 0xb4a   : > { %v2937_v19 = vpop.f32.mrb[53].mxu0 }
 0xb4b   : > { %v2193_v62 = vpop.f32.mrb[54].mxu0 }
 0xb4c   : > { %v2938_v22 = vpop.f32.mrb[55].mxu0 }
 0xb69   : > { %v2232_v13 = vpop.f32.mrb[56].mxu0 }
 0xb6a   : > { %v2282_v56 = vadd.f32 %v2232_v13, %v3736_v25  ;;  %v2234_v23 = vpop.f32.mrb[57].mxu0  ;;  %v2287_v25 = vadd.f32 %v2278_v10, %v3759_v0 }
 0xb6b   : > { %v2236_v35 = vpop.f32.mrb[58].mxu0  ;;  %v2283_v31 = vadd.f32 %v2234_v23, %v3746_v21 }
 0xb6c   : > { %v2569_v43 = vmul.f32 -1.442695, %v2282_v56  ;;  %v2285_v49 = vadd.f32 %v2236_v35, %v3740_v29  ;;  %v2238_v51 = vpop.f32.mrb[59].mxu0 }
 0xb6d   : > { %v2286_v55 = vadd.f32 %v2238_v51, %v3750_v1  ;;  %v2571_v57 = vmul.f32 -1.442695, %v2283_v31 }
 0xb6e   : > { %3204 = vpow2.f32 %v2569_v43  ;;  %v2570_v54 = vmul.f32 -1.442695, %v2285_v49 }
 0xb6f   : > { %v2572_v59 = vmul.f32 -1.442695, %v2286_v55 }
 0xb70   : > { %3206 = vpow2.f32 %v2570_v54 }
 0xb71   : > { %3208 = vpow2.f32 %v2571_v57 }
 0xb72   : > { %3210 = vtanh.f32 %v2284_v58 }
 0xb73   : > { %3212 = vpow2.f32 %v2572_v59 }
 0xb78   : > { %v3205_v60 = vpop.eup %3204 }
 0xb79   : > { %v2294_v61 = vadd.f32 1.0, %v3205_v60 }
 0xb7a   : > { %v3207_v4 = vpop.eup %3206 }
 0xb7b   : > { %3214 = vrcp.f32 %v2294_v61  ;;  %v2295_v29 = vadd.f32 1.0, %v3207_v4  ;;  %v3209_v21 = vpop.eup %3208 }
 0xb7c   : > { %3216 = vtanh.f32 %v2287_v25  ;;  %v3211_v5 = vpop.eup %3210  ;;  %v2306_v7 = vadd.f32 1.0, %v3209_v21 }
 0xb7d   : > { %3218 = vrcp.f32 %v2295_v29  ;;  %v3213_v6 = vpop.eup %3212 }
 0xb7e   : > { %v2307_v39 = vadd.f32 1.0, %v3213_v6  ;;  %3220 = vrcp.f32 %v2306_v7 }
 0xb85   : > { %v3215_v1 = vpop.eup %3214 }
 0xb86   : > { %v3217_v12 = vpop.eup %3216  ;;  %v2314_v24 = vmul.f32 %v3215_v1, %v3211_v5 }
 0xb87   : > { %v3219_v38 = vpop.eup %3218 }
 0xb88   : > { %v2316_v0 = vadd.f32 %v2314_v24, %v2190_v17  ;;  %v2315_v27 = vmul.f32 %v3219_v38, %v3217_v12  ;;  %v3221_v30 = vpop.eup %3220 }
 0xb8a   : > { %3222 = vtanh.f32 %v2316_v0  ;;  %v2317_v16 = vadd.f32 %v2315_v27, %v2193_v62 }
 0xb8b   : > { %3224 = vrcp.f32 %v2307_v39 }
 0xb8c   : > { %3226 = vtanh.f32 %v2317_v16 }
 0xb94   : > { %v3223_v40 = vpop.eup %3222 }
 0xb95   : > { %v3225_v36 = vpop.eup %3224  ;;  %v2322_v37 = vmul.f32 %v3223_v40, %v3221_v30 }
 0xb96   : > { %v3227_v11 = vpop.eup %3226 }
 0xb97   : > { %v2323_v15 = vmul.f32 %v3227_v11, %v3225_v36 }
 0xb99   : > { %v2329_v41 = vpack.c.bf16 %v2323_v15, %v2322_v37 }
 0xb9b   : > { %2960 = vmatpush3.bf16.msra.mxu0 %v2329_v41 }
 0xb9e   : > { %2962 = vmatmul.mubr.msk.bf16.vlgmr.msra.gmra.mrb[60].mxu0 %vm673_vm1, %v2326_v14 }
 0xc71   : > { %v2367_v52 = vpop.f32.mrb[60].mxu0 }
 0xc72   : > { %2373 = vst [vmem:[%s355_s16] sm:$0x1] %v2367_v52  ;;  %v2963_v50 = vpop.f32.mrb[61].mxu0 }
 0xc73   : > { %v2370_v42 = vpop.f32.mrb[62].mxu0 }
 0xc74   : > { %v2964_v3 = vpop.f32.mrb[63].mxu0 }
 0xc75 PF: > { %s18_s27 = sadd.s32 1, %s3267_s27  }
 0xc76   : > { %p15_p4 = scmp.ge.s32.totalorder %s18_s27, 4  }
 0xc78   :  { %17 = sbr.rel (!%p15_p4) target bundleno = 1 (0x1), region = 91 }

</bundles_post_ra>
